<compile_context>
chip_gen: v7x
topology: tpu7x:2x2x1
jax: 0.10.0
libtpu: 0.0.40
codegen_flags: <defaults>
</compile_context>

<pallas_src>
import numpy as np
import jax
import jax.numpy as jnp
from jax.experimental import pallas as pl
from jax.experimental.pallas import tpu as pltpu

# ----------------------- small config (consistent with LLaMAConfig) ------------
B = 2            # batch
T = 8            # sequence length
C = 32           # n_embd
NH = 4           # n_head
HS = C // NH     # head_size = 8
AT = 10          # adapter_prompt_length
HID = 256        # MLP hidden = find_multiple(int(2*4*C/3), 256) = 256 for C=32
EPS = 1e-5
SCALE = 1.0 / (HS ** 0.5)
BT = B * T       # folded rows


def _matmul_nt(a, w):
    # a: (M, K), w: (N, K) -> (M, N)   == a @ w.T  (PyTorch nn.Linear, no bias)
    return jax.lax.dot_general(a, w, (((1,), (1,)), ((), ())),
                               preferred_element_type=jnp.float32)


# ------------------------------- the fused kernel -------------------------------
def block_kernel(x_ref, rms1_ref, rms2_ref, w_attn_ref, w_proj_ref,
                 prefix_ref, cos2_ref, sin2_ref, rot2_ref, mask_ref,
                 w_fc12_ref, w_mproj_ref, gate_ref,
                 out_ref, ak_ref, av_ref, y_scr):
    x = x_ref[...]                                        # (BT, C): batch folded into rows

    # ---- RMSNorm 1 ----
    ms = jnp.mean(x * x, axis=-1, keepdims=True)
    xn = x * jax.lax.rsqrt(ms + EPS) * rms1_ref[...]      # rms1_ref: (1, C)

    # ---- fused qkv projection: token rows + adapter-prefix rows, one MXU call ----
    xa = jnp.concatenate([xn, prefix_ref[...]], axis=0)   # (BT + AT, C)
    qkva = _matmul_nt(xa, w_attn_ref[...])                # (BT + AT, 3C)
    qkv = qkva[:BT]
    akv = qkva[BT:]
    ak = akv[:, C:2 * C]                                  # adapter K/V: no RoPE
    av = akv[:, 2 * C:3 * C]
    ak_ref[...] = ak
    av_ref[...] = av

    # ---- RoPE on q and k with a single matmul (block-diag signed pair-swap) ----
    qk = qkv[:, :2 * C]                                   # (BT, 2C) = [q | k] lanes
    qk = qk * cos2_ref[...] + jnp.dot(qk, rot2_ref[...],
                                      preferred_element_type=jnp.float32) * sin2_ref[...]
    q = qk[:, :C]
    k = qk[:, C:]
    v = qkv[:, 2 * C:3 * C]

    mask = mask_ref[...]                                  # (BT, BT) additive block-diag causal

    # ---- per-head attention + gated adapter-prompt attention ----
    for h in range(NH):                                   # static unroll (NH small)
        sl = slice(h * HS, (h + 1) * HS)
        qh, kh, vh = q[:, sl], k[:, sl], v[:, sl]

        s = _matmul_nt(qh, kh) * SCALE + mask             # (BT, BT)
        s = s - jnp.max(s, axis=-1, keepdims=True)
        p = jnp.exp(s)
        p = p * pl.reciprocal(jnp.sum(p, axis=-1, keepdims=True), approx=True)
        yh = jnp.dot(p, vh, preferred_element_type=jnp.float32)

        sa = _matmul_nt(qh, ak[:, sl]) * SCALE            # (BT, AT), no mask
        sa = sa - jnp.max(sa, axis=-1, keepdims=True)
        pa = jnp.exp(sa)
        pa = pa * pl.reciprocal(jnp.sum(pa, axis=-1, keepdims=True), approx=True)
        ayh = jnp.dot(pa, av[:, sl], preferred_element_type=jnp.float32)

        g = gate_ref[0, h]                                # scalar from SMEM
        y_scr[:, sl] = yh + g * ayh                       # write into scratch; no concat

    y = _matmul_nt(y_scr[...], w_proj_ref[...])           # c_proj

    # ---- first residual ----
    x1 = x + y

    # ---- RMSNorm 2 + fused SwiGLU MLP + second residual ----
    ms2 = jnp.mean(x1 * x1, axis=-1, keepdims=True)
    x2n = x1 * jax.lax.rsqrt(ms2 + EPS) * rms2_ref[...]
    h12 = _matmul_nt(x2n, w_fc12_ref[...])                # (BT, 2*HID): fc1 | fc2 fused
    h1 = h12[:, :HID]
    h2 = h12[:, HID:]
    m = _matmul_nt(jax.nn.silu(h1) * h2, w_mproj_ref[...])  # (BT, C)

    out_ref[...] = x1 + m


# --------------------------------- wrapper --------------------------------------
def adapter_block_forward(x, params, cos2, sin2, rot2, mask_add):
    x2d = x.reshape(BT, C)
    w_fc12 = jnp.concatenate([params["w_fc1"], params["w_fc2"]], axis=0)   # (2*HID, C)

    vmem_specs = [pl.BlockSpec(memory_space=pltpu.MemorySpace.VMEM) for _ in range(12)]
    smem_spec = pl.BlockSpec(memory_space=pltpu.MemorySpace.SMEM)          # gate -> SMEM
    in_specs = vmem_specs + [smem_spec]
    out_specs = tuple(pl.BlockSpec(memory_space=pltpu.MemorySpace.VMEM) for _ in range(3))
    out_shape = (
        jax.ShapeDtypeStruct((BT, C), jnp.float32),
        jax.ShapeDtypeStruct((AT, C), jnp.float32),
        jax.ShapeDtypeStruct((AT, C), jnp.float32),
    )

    out2d, ak, av = pl.pallas_call(
        block_kernel,
        out_shape=out_shape,
        in_specs=in_specs,
        out_specs=out_specs,
        scratch_shapes=[pltpu.VMEM((BT, C), jnp.float32)],
    )(x2d, params["rms1"], params["rms2"], params["w_attn"], params["w_proj"],
      params["prefix"], cos2, sin2, rot2, mask_add,
      w_fc12, params["w_mproj"], params["gate"])

    out = out2d.reshape(B, T, C)
    # adapter KV cache in PyTorch layout: (B, n_head, adapter_len, head_size);
    # it is identical across batch, so compute once in-kernel and broadcast here.
    akh = jnp.broadcast_to(ak.reshape(AT, NH, HS).transpose(1, 0, 2)[None],
                           (B, NH, AT, HS))
    avh = jnp.broadcast_to(av.reshape(AT, NH, HS).transpose(1, 0, 2)[None],
                           (B, NH, AT, HS))
    return out, None, (akh, avh)


# ------------------------- pure-JAX reference (for checking) --------------------
def reference_forward(x, params, cos, sin, mask_bool):
    def rms(z, scale):
        return z * jax.lax.rsqrt(jnp.mean(z * z, axis=-1, keepdims=True) + EPS) * scale

    xn = rms(x, params["rms1"][0])
    qkv = xn @ params["w_attn"].T
    q, k, v = jnp.split(qkv, 3, axis=-1)

    def heads(z):
        return z.reshape(B, T, NH, HS).transpose(0, 2, 1, 3)

    def rope(z):
        zr = z.reshape(B, NH, T, HS // 2, 2)
        c = cos[None, None]; s = sin[None, None]
        o = jnp.stack([zr[..., 0] * c - zr[..., 1] * s,
                       zr[..., 1] * c + zr[..., 0] * s], axis=-1)
        return o.reshape(B, NH, T, HS)

    qh, kh, vh = rope(heads(q)), rope(heads(k)), heads(v)
    s = jnp.einsum('bhqd,bhkd->bhqk', qh, kh) * SCALE
    s = jnp.where(mask_bool[None, None], s, -jnp.inf)
    y = jnp.einsum('bhqk,bhkd->bhqd', jax.nn.softmax(s, axis=-1), vh)

    akv = params["prefix"] @ params["w_attn"].T
    _, ak, av = jnp.split(akv, 3, axis=-1)
    akh = ak.reshape(AT, NH, HS).transpose(1, 0, 2)
    avh = av.reshape(AT, NH, HS).transpose(1, 0, 2)
    sa = jnp.einsum('bhqd,hkd->bhqk', qh, akh) * SCALE
    ay = jnp.einsum('bhqk,hkd->bhqd', jax.nn.softmax(sa, axis=-1), avh)
    gate = params["gate"][0][None, :, None, None]
    y = y + gate * ay

    y = y.transpose(0, 2, 1, 3).reshape(B, T, C) @ params["w_proj"].T
    x1 = x + y
    x2n = rms(x1, params["rms2"][0])
    m = (jax.nn.silu(x2n @ params["w_fc1"].T) * (x2n @ params["w_fc2"].T)) @ params["w_mproj"].T
    return x1 + m


# ----------------------------------- main ----------------------------------------
if __name__ == "__main__":
    key = jax.random.PRNGKey(0)
    keys = jax.random.split(key, 10)

    def init(k, shape, std=0.02):
        return std * jax.random.normal(k, shape, jnp.float32)

    params = {
        "rms1": jnp.ones((1, C), jnp.float32),
        "rms2": jnp.ones((1, C), jnp.float32),
        "w_attn": init(keys[0], (3 * C, C)),       # c_attn.weight
        "w_proj": init(keys[1], (C, C)),           # c_proj.weight
        "prefix": init(keys[2], (AT, C)),          # adapter_wte.weight
        # gating_factor is zero-init in the module; use nonzero deterministic
        # values here so the adapter branch actually contributes in this test.
        "gate": 0.5 + 0.1 * jax.random.normal(keys[3], (1, NH), jnp.float32),
        "w_fc1": init(keys[4], (HID, C)),
        "w_fc2": init(keys[5], (HID, C)),
        "w_mproj": init(keys[6], (C, HID)),
    }
    x = jax.random.normal(keys[7], (B, T, C), jnp.float32)

    # RoPE cache (lit_llama build_rope_cache semantics, n_elem = head_size)
    half = HS // 2
    theta = 1.0 / (10000.0 ** (np.arange(0, HS, 2, dtype=np.float32) / HS))
    ang = np.outer(np.arange(T, dtype=np.float32), theta)        # (T, half)
    cos = np.cos(ang).astype(np.float32)
    sin = np.sin(ang).astype(np.float32)
    cos_tc = np.tile(np.repeat(cos, 2, axis=1), (1, NH))         # (T, C)
    sin_tc = np.tile(np.repeat(sin, 2, axis=1), (1, NH))         # (T, C)
    # fold batch into rows, then double along lanes so RoPE covers [q | k] at once
    cos2 = jnp.asarray(np.tile(np.tile(cos_tc, (B, 1)), (1, 2)))  # (BT, 2C)
    sin2 = jnp.asarray(np.tile(np.tile(sin_tc, (B, 1)), (1, 2)))  # (BT, 2C)

    # signed pair-swap matrix over 2C lanes (block-diag for the q and k halves):
    # (x @ rot2)[2i] = -x[2i+1], (x @ rot2)[2i+1] = x[2i]
    rot2_np = np.zeros((2 * C, 2 * C), np.float32)
    for i in range(C):
        rot2_np[2 * i + 1, 2 * i] = -1.0
        rot2_np[2 * i, 2 * i + 1] = 1.0
    rot2 = jnp.asarray(rot2_np)

    # block-diagonal causal additive mask over the folded (B*T) rows
    mask_bool_np = np.tril(np.ones((T, T), dtype=bool))
    tri_add = np.where(mask_bool_np, 0.0, -1e30).astype(np.float32)
    mask_np = np.full((BT, BT), -1e30, np.float32)
    for b in range(B):
        mask_np[b * T:(b + 1) * T, b * T:(b + 1) * T] = tri_add
    mask_add = jnp.asarray(mask_np)

    out, new_kv, (ak, av) = adapter_block_forward(x, params, cos2, sin2, rot2, mask_add)
    out = jax.block_until_ready(out)
    ak = jax.block_until_ready(ak)
    av = jax.block_until_ready(av)

    ref = reference_forward(x, params, jnp.asarray(cos), jnp.asarray(sin),
                            jnp.asarray(mask_bool_np))
    # tolerance covers the approximate (EUP) reciprocal in the softmax normalizers
    np.testing.assert_allclose(np.asarray(out), np.asarray(ref), rtol=1e-3, atol=1e-3)
    assert ak.shape == (B, NH, AT, HS) and av.shape == (B, NH, AT, HS)

    print("KERNEL_OK")
</pallas_src>

<mosaic_0001>
module attributes {stable_mosaic.version = 11 : i64} {
  func.func @block_kernel(%arg0: memref<16x32xf32, #tpu.memory_space<vmem>>, %arg1: memref<1x32xf32, #tpu.memory_space<vmem>>, %arg2: memref<1x32xf32, #tpu.memory_space<vmem>>, %arg3: memref<96x32xf32, #tpu.memory_space<vmem>>, %arg4: memref<32x32xf32, #tpu.memory_space<vmem>>, %arg5: memref<10x32xf32, #tpu.memory_space<vmem>>, %arg6: memref<16x64xf32, #tpu.memory_space<vmem>>, %arg7: memref<16x64xf32, #tpu.memory_space<vmem>>, %arg8: memref<64x64xf32, #tpu.memory_space<vmem>>, %arg9: memref<16x16xf32, #tpu.memory_space<vmem>>, %arg10: memref<512x32xf32, #tpu.memory_space<vmem>>, %arg11: memref<32x256xf32, #tpu.memory_space<vmem>>, %arg12: memref<1x4xf32, #tpu.memory_space<smem>>, %arg13: memref<16x32xf32, #tpu.memory_space<vmem>>, %arg14: memref<10x32xf32, #tpu.memory_space<vmem>>, %arg15: memref<10x32xf32, #tpu.memory_space<vmem>>, %arg16: memref<16x32xf32, #tpu.memory_space<vmem>>) attributes {dimension_semantics = [], scalar_prefetch = 0 : i64, scratch_operands = 1 : i64, tpu.core_type = #tpu.core_type<tc>} {
    %c0 = arith.constant 0 : index
    %c0_0 = arith.constant 0 : index
    %0 = vector.load %arg0[%c0, %c0_0] : memref<16x32xf32, #tpu.memory_space<vmem>>, vector<16x32xf32>
    %1 = arith.mulf %0, %0 : vector<16x32xf32>
    %cst = arith.constant dense<0.000000e+00> : vector<16xf32>
    %2 = vector.multi_reduction <add>, %1, %cst [1] : vector<16x32xf32> to vector<16xf32>
    %3 = vector.shape_cast %2 : vector<16xf32> to vector<16x1xf32>
    %cst_1 = arith.constant 3.200000e+01 : f32
    %4 = vector.broadcast %cst_1 : f32 to vector<16x1xf32>
    %5 = arith.divf %3, %4 : vector<16x1xf32>
    %cst_2 = arith.constant 9.99999974E-6 : f32
    %6 = vector.broadcast %cst_2 : f32 to vector<16x1xf32>
    %7 = arith.addf %5, %6 : vector<16x1xf32>
    %8 = math.rsqrt %7 : vector<16x1xf32>
    %9 = vector.broadcast %8 : vector<16x1xf32> to vector<16x32xf32>
    %10 = arith.mulf %0, %9 : vector<16x32xf32>
    %c0_3 = arith.constant 0 : index
    %c0_4 = arith.constant 0 : index
    %11 = vector.load %arg1[%c0_3, %c0_4] : memref<1x32xf32, #tpu.memory_space<vmem>>, vector<1x32xf32>
    %12 = vector.broadcast %11 : vector<1x32xf32> to vector<16x32xf32>
    %13 = arith.mulf %10, %12 : vector<16x32xf32>
    %c0_5 = arith.constant 0 : index
    %c0_6 = arith.constant 0 : index
    %14 = vector.load %arg5[%c0_5, %c0_6] : memref<10x32xf32, #tpu.memory_space<vmem>>, vector<10x32xf32>
    %15 = tpu.concatenate %13, %14 in 0 : vector<16x32xf32>, vector<10x32xf32> -> vector<26x32xf32>
    %c0_7 = arith.constant 0 : index
    %c0_8 = arith.constant 0 : index
    %16 = vector.load %arg3[%c0_7, %c0_8] : memref<96x32xf32, #tpu.memory_space<vmem>>, vector<96x32xf32>
    %cst_9 = arith.constant dense<0.000000e+00> : vector<26x96xf32>
    %17 = tpu.matmul %15, %16, %cst_9 {dimension_numbers = #tpu.dot_dimension_numbers<[1], [1], [0], [0], [0, 0, 1, 0], [], []>} : vector<26x32xf32>, vector<96x32xf32>, vector<26x96xf32> -> vector<26x96xf32>
    %18 = vector.extract_strided_slice %17 {offsets = [0, 0], sizes = [16, 96], strides = [1, 1]} : vector<26x96xf32> to vector<16x96xf32>
    %19 = vector.extract_strided_slice %17 {offsets = [16, 0], sizes = [10, 96], strides = [1, 1]} : vector<26x96xf32> to vector<10x96xf32>
    %20 = vector.extract_strided_slice %19 {offsets = [0, 32], sizes = [10, 32], strides = [1, 1]} : vector<10x96xf32> to vector<10x32xf32>
    %21 = vector.extract_strided_slice %19 {offsets = [0, 64], sizes = [10, 32], strides = [1, 1]} : vector<10x96xf32> to vector<10x32xf32>
    %c0_10 = arith.constant 0 : index
    %c0_11 = arith.constant 0 : index
    %22 = vector.load %arg14[%c0_10, %c0_11] : memref<10x32xf32, #tpu.memory_space<vmem>>, vector<10x32xf32>
    tpu.vector_store %arg14[%c0_10, %c0_11], %20 {strides = array<i32>} : memref<10x32xf32, #tpu.memory_space<vmem>>, vector<10x32xf32>,
    %c0_12 = arith.constant 0 : index
    %c0_13 = arith.constant 0 : index
    %23 = vector.load %arg15[%c0_12, %c0_13] : memref<10x32xf32, #tpu.memory_space<vmem>>, vector<10x32xf32>
    tpu.vector_store %arg15[%c0_12, %c0_13], %21 {strides = array<i32>} : memref<10x32xf32, #tpu.memory_space<vmem>>, vector<10x32xf32>,
    %24 = vector.extract_strided_slice %18 {offsets = [0, 0], sizes = [16, 64], strides = [1, 1]} : vector<16x96xf32> to vector<16x64xf32>
    %c0_14 = arith.constant 0 : index
    %c0_15 = arith.constant 0 : index
    %25 = vector.load %arg6[%c0_14, %c0_15] : memref<16x64xf32, #tpu.memory_space<vmem>>, vector<16x64xf32>
    %26 = arith.mulf %24, %25 : vector<16x64xf32>
    %c0_16 = arith.constant 0 : index
    %c0_17 = arith.constant 0 : index
    %27 = vector.load %arg8[%c0_16, %c0_17] : memref<64x64xf32, #tpu.memory_space<vmem>>, vector<64x64xf32>
    %cst_18 = arith.constant dense<0.000000e+00> : vector<16x64xf32>
    %28 = tpu.matmul %24, %27, %cst_18 {dimension_numbers = #tpu.dot_dimension_numbers<[1], [0], [0], [1], [0, 0, 1, 1], [], []>} : vector<16x64xf32>, vector<64x64xf32>, vector<16x64xf32> -> vector<16x64xf32>
    %c0_19 = arith.constant 0 : index
    %c0_20 = arith.constant 0 : index
    %29 = vector.load %arg7[%c0_19, %c0_20] : memref<16x64xf32, #tpu.memory_space<vmem>>, vector<16x64xf32>
    %30 = arith.mulf %28, %29 : vector<16x64xf32>
    %31 = arith.addf %26, %30 : vector<16x64xf32>
    %32 = vector.extract_strided_slice %31 {offsets = [0, 0], sizes = [16, 32], strides = [1, 1]} : vector<16x64xf32> to vector<16x32xf32>
    %33 = vector.extract_strided_slice %31 {offsets = [0, 32], sizes = [16, 32], strides = [1, 1]} : vector<16x64xf32> to vector<16x32xf32>
    %34 = vector.extract_strided_slice %18 {offsets = [0, 64], sizes = [16, 32], strides = [1, 1]} : vector<16x96xf32> to vector<16x32xf32>
    %c0_21 = arith.constant 0 : index
    %c0_22 = arith.constant 0 : index
    %35 = vector.load %arg9[%c0_21, %c0_22] : memref<16x16xf32, #tpu.memory_space<vmem>>, vector<16x16xf32>
    %36 = vector.extract_strided_slice %32 {offsets = [0, 0], sizes = [16, 8], strides = [1, 1]} : vector<16x32xf32> to vector<16x8xf32>
    %37 = vector.extract_strided_slice %33 {offsets = [0, 0], sizes = [16, 8], strides = [1, 1]} : vector<16x32xf32> to vector<16x8xf32>
    %38 = vector.extract_strided_slice %34 {offsets = [0, 0], sizes = [16, 8], strides = [1, 1]} : vector<16x32xf32> to vector<16x8xf32>
    %cst_23 = arith.constant dense<0.000000e+00> : vector<16x16xf32>
    %39 = tpu.matmul %36, %37, %cst_23 {dimension_numbers = #tpu.dot_dimension_numbers<[1], [1], [0], [0], [0, 0, 1, 0], [], []>} : vector<16x8xf32>, vector<16x8xf32>, vector<16x16xf32> -> vector<16x16xf32>
    %cst_24 = arith.constant 0.353553385 : f32
    %40 = vector.broadcast %cst_24 : f32 to vector<16x16xf32>
    %41 = arith.mulf %39, %40 : vector<16x16xf32>
    %42 = arith.addf %41, %35 : vector<16x16xf32>
    %cst_25 = arith.constant dense<0xFF800000> : vector<16xf32>
    %43 = vector.multi_reduction <maximumf>, %42, %cst_25 [1] : vector<16x16xf32> to vector<16xf32>
    %44 = vector.shape_cast %43 : vector<16xf32> to vector<16x1xf32>
    %45 = vector.broadcast %44 : vector<16x1xf32> to vector<16x16xf32>
    %46 = arith.subf %42, %45 : vector<16x16xf32>
    %47 = math.exp %46 : vector<16x16xf32>
    %cst_26 = arith.constant dense<0.000000e+00> : vector<16xf32>
    %48 = vector.multi_reduction <add>, %47, %cst_26 [1] : vector<16x16xf32> to vector<16xf32>
    %49 = vector.shape_cast %48 : vector<16xf32> to vector<16x1xf32>
    %50 = tpu.reciprocal %49 {approx = true} : vector<16x1xf32> -> vector<16x1xf32>
    %51 = vector.broadcast %50 : vector<16x1xf32> to vector<16x16xf32>
    %52 = arith.mulf %47, %51 : vector<16x16xf32>
    %cst_27 = arith.constant dense<0.000000e+00> : vector<16x8xf32>
    %53 = tpu.matmul %52, %38, %cst_27 {dimension_numbers = #tpu.dot_dimension_numbers<[1], [0], [0], [1], [0, 0, 1, 1], [], []>} : vector<16x16xf32>, vector<16x8xf32>, vector<16x8xf32> -> vector<16x8xf32>
    %54 = vector.extract_strided_slice %20 {offsets = [0, 0], sizes = [10, 8], strides = [1, 1]} : vector<10x32xf32> to vector<10x8xf32>
    %cst_28 = arith.constant dense<0.000000e+00> : vector<16x10xf32>
    %55 = tpu.matmul %36, %54, %cst_28 {dimension_numbers = #tpu.dot_dimension_numbers<[1], [1], [0], [0], [0, 0, 1, 0], [], []>} : vector<16x8xf32>, vector<10x8xf32>, vector<16x10xf32> -> vector<16x10xf32>
    %cst_29 = arith.constant 0.353553385 : f32
    %56 = vector.broadcast %cst_29 : f32 to vector<16x10xf32>
    %57 = arith.mulf %55, %56 : vector<16x10xf32>
    %cst_30 = arith.constant dense<0xFF800000> : vector<16xf32>
    %58 = vector.multi_reduction <maximumf>, %57, %cst_30 [1] : vector<16x10xf32> to vector<16xf32>
    %59 = vector.shape_cast %58 : vector<16xf32> to vector<16x1xf32>
    %60 = vector.broadcast %59 : vector<16x1xf32> to vector<16x10xf32>
    %61 = arith.subf %57, %60 : vector<16x10xf32>
    %62 = math.exp %61 : vector<16x10xf32>
    %cst_31 = arith.constant dense<0.000000e+00> : vector<16xf32>
    %63 = vector.multi_reduction <add>, %62, %cst_31 [1] : vector<16x10xf32> to vector<16xf32>
    %64 = vector.shape_cast %63 : vector<16xf32> to vector<16x1xf32>
    %65 = tpu.reciprocal %64 {approx = true} : vector<16x1xf32> -> vector<16x1xf32>
    %66 = vector.broadcast %65 : vector<16x1xf32> to vector<16x10xf32>
    %67 = arith.mulf %62, %66 : vector<16x10xf32>
    %68 = vector.extract_strided_slice %21 {offsets = [0, 0], sizes = [10, 8], strides = [1, 1]} : vector<10x32xf32> to vector<10x8xf32>
    %cst_32 = arith.constant dense<0.000000e+00> : vector<16x8xf32>
    %69 = tpu.matmul %67, %68, %cst_32 {dimension_numbers = #tpu.dot_dimension_numbers<[1], [0], [0], [1], [0, 0, 1, 1], [], []>} : vector<16x10xf32>, vector<10x8xf32>, vector<16x8xf32> -> vector<16x8xf32>
    %c0_33 = arith.constant 0 : index
    %c0_34 = arith.constant 0 : index
    %70 = memref.load %arg12[%c0_33, %c0_34] : memref<1x4xf32, #tpu.memory_space<smem>>
    %71 = vector.broadcast %70 : f32 to vector<16x8xf32>
    %72 = arith.mulf %71, %69 : vector<16x8xf32>
    %73 = arith.addf %53, %72 : vector<16x8xf32>
    %c0_35 = arith.constant 0 : index
    %c0_36 = arith.constant 0 : index
    %74 = vector.load %arg16[%c0_35, %c0_36] : memref<16x32xf32, #tpu.memory_space<vmem>>, vector<16x8xf32>
    tpu.vector_store %arg16[%c0_35, %c0_36], %73 {strides = array<i32>} : memref<16x32xf32, #tpu.memory_space<vmem>>, vector<16x8xf32>,
    %75 = vector.extract_strided_slice %32 {offsets = [0, 8], sizes = [16, 8], strides = [1, 1]} : vector<16x32xf32> to vector<16x8xf32>
    %76 = vector.extract_strided_slice %33 {offsets = [0, 8], sizes = [16, 8], strides = [1, 1]} : vector<16x32xf32> to vector<16x8xf32>
    %77 = vector.extract_strided_slice %34 {offsets = [0, 8], sizes = [16, 8], strides = [1, 1]} : vector<16x32xf32> to vector<16x8xf32>
    %cst_37 = arith.constant dense<0.000000e+00> : vector<16x16xf32>
    %78 = tpu.matmul %75, %76, %cst_37 {dimension_numbers = #tpu.dot_dimension_numbers<[1], [1], [0], [0], [0, 0, 1, 0], [], []>} : vector<16x8xf32>, vector<16x8xf32>, vector<16x16xf32> -> vector<16x16xf32>
    %cst_38 = arith.constant 0.353553385 : f32
    %79 = vector.broadcast %cst_38 : f32 to vector<16x16xf32>
    %80 = arith.mulf %78, %79 : vector<16x16xf32>
    %81 = arith.addf %80, %35 : vector<16x16xf32>
    %cst_39 = arith.constant dense<0xFF800000> : vector<16xf32>
    %82 = vector.multi_reduction <maximumf>, %81, %cst_39 [1] : vector<16x16xf32> to vector<16xf32>
    %83 = vector.shape_cast %82 : vector<16xf32> to vector<16x1xf32>
    %84 = vector.broadcast %83 : vector<16x1xf32> to vector<16x16xf32>
    %85 = arith.subf %81, %84 : vector<16x16xf32>
    %86 = math.exp %85 : vector<16x16xf32>
    %cst_40 = arith.constant dense<0.000000e+00> : vector<16xf32>
    %87 = vector.multi_reduction <add>, %86, %cst_40 [1] : vector<16x16xf32> to vector<16xf32>
    %88 = vector.shape_cast %87 : vector<16xf32> to vector<16x1xf32>
    %89 = tpu.reciprocal %88 {approx = true} : vector<16x1xf32> -> vector<16x1xf32>
    %90 = vector.broadcast %89 : vector<16x1xf32> to vector<16x16xf32>
    %91 = arith.mulf %86, %90 : vector<16x16xf32>
    %cst_41 = arith.constant dense<0.000000e+00> : vector<16x8xf32>
    %92 = tpu.matmul %91, %77, %cst_41 {dimension_numbers = #tpu.dot_dimension_numbers<[1], [0], [0], [1], [0, 0, 1, 1], [], []>} : vector<16x16xf32>, vector<16x8xf32>, vector<16x8xf32> -> vector<16x8xf32>
    %93 = vector.extract_strided_slice %20 {offsets = [0, 8], sizes = [10, 8], strides = [1, 1]} : vector<10x32xf32> to vector<10x8xf32>
    %cst_42 = arith.constant dense<0.000000e+00> : vector<16x10xf32>
    %94 = tpu.matmul %75, %93, %cst_42 {dimension_numbers = #tpu.dot_dimension_numbers<[1], [1], [0], [0], [0, 0, 1, 0], [], []>} : vector<16x8xf32>, vector<10x8xf32>, vector<16x10xf32> -> vector<16x10xf32>
    %cst_43 = arith.constant 0.353553385 : f32
    %95 = vector.broadcast %cst_43 : f32 to vector<16x10xf32>
    %96 = arith.mulf %94, %95 : vector<16x10xf32>
    %cst_44 = arith.constant dense<0xFF800000> : vector<16xf32>
    %97 = vector.multi_reduction <maximumf>, %96, %cst_44 [1] : vector<16x10xf32> to vector<16xf32>
    %98 = vector.shape_cast %97 : vector<16xf32> to vector<16x1xf32>
    %99 = vector.broadcast %98 : vector<16x1xf32> to vector<16x10xf32>
    %100 = arith.subf %96, %99 : vector<16x10xf32>
    %101 = math.exp %100 : vector<16x10xf32>
    %cst_45 = arith.constant dense<0.000000e+00> : vector<16xf32>
    %102 = vector.multi_reduction <add>, %101, %cst_45 [1] : vector<16x10xf32> to vector<16xf32>
    %103 = vector.shape_cast %102 : vector<16xf32> to vector<16x1xf32>
    %104 = tpu.reciprocal %103 {approx = true} : vector<16x1xf32> -> vector<16x1xf32>
    %105 = vector.broadcast %104 : vector<16x1xf32> to vector<16x10xf32>
    %106 = arith.mulf %101, %105 : vector<16x10xf32>
    %107 = vector.extract_strided_slice %21 {offsets = [0, 8], sizes = [10, 8], strides = [1, 1]} : vector<10x32xf32> to vector<10x8xf32>
    %cst_46 = arith.constant dense<0.000000e+00> : vector<16x8xf32>
    %108 = tpu.matmul %106, %107, %cst_46 {dimension_numbers = #tpu.dot_dimension_numbers<[1], [0], [0], [1], [0, 0, 1, 1], [], []>} : vector<16x10xf32>, vector<10x8xf32>, vector<16x8xf32> -> vector<16x8xf32>
    %c0_47 = arith.constant 0 : index
    %c1 = arith.constant 1 : index
    %109 = memref.load %arg12[%c0_47, %c1] : memref<1x4xf32, #tpu.memory_space<smem>>
    %110 = vector.broadcast %109 : f32 to vector<16x8xf32>
    %111 = arith.mulf %110, %108 : vector<16x8xf32>
    %112 = arith.addf %92, %111 : vector<16x8xf32>
    %c0_48 = arith.constant 0 : index
    %c8 = arith.constant 8 : index
    %113 = vector.load %arg16[%c0_48, %c8] : memref<16x32xf32, #tpu.memory_space<vmem>>, vector<16x8xf32>
    tpu.vector_store %arg16[%c0_48, %c8], %112 {strides = array<i32>} : memref<16x32xf32, #tpu.memory_space<vmem>>, vector<16x8xf32>,
    %114 = vector.extract_strided_slice %32 {offsets = [0, 16], sizes = [16, 8], strides = [1, 1]} : vector<16x32xf32> to vector<16x8xf32>
    %115 = vector.extract_strided_slice %33 {offsets = [0, 16], sizes = [16, 8], strides = [1, 1]} : vector<16x32xf32> to vector<16x8xf32>
    %116 = vector.extract_strided_slice %34 {offsets = [0, 16], sizes = [16, 8], strides = [1, 1]} : vector<16x32xf32> to vector<16x8xf32>
    %cst_49 = arith.constant dense<0.000000e+00> : vector<16x16xf32>
    %117 = tpu.matmul %114, %115, %cst_49 {dimension_numbers = #tpu.dot_dimension_numbers<[1], [1], [0], [0], [0, 0, 1, 0], [], []>} : vector<16x8xf32>, vector<16x8xf32>, vector<16x16xf32> -> vector<16x16xf32>
    %cst_50 = arith.constant 0.353553385 : f32
    %118 = vector.broadcast %cst_50 : f32 to vector<16x16xf32>
    %119 = arith.mulf %117, %118 : vector<16x16xf32>
    %120 = arith.addf %119, %35 : vector<16x16xf32>
    %cst_51 = arith.constant dense<0xFF800000> : vector<16xf32>
    %121 = vector.multi_reduction <maximumf>, %120, %cst_51 [1] : vector<16x16xf32> to vector<16xf32>
    %122 = vector.shape_cast %121 : vector<16xf32> to vector<16x1xf32>
    %123 = vector.broadcast %122 : vector<16x1xf32> to vector<16x16xf32>
    %124 = arith.subf %120, %123 : vector<16x16xf32>
    %125 = math.exp %124 : vector<16x16xf32>
    %cst_52 = arith.constant dense<0.000000e+00> : vector<16xf32>
    %126 = vector.multi_reduction <add>, %125, %cst_52 [1] : vector<16x16xf32> to vector<16xf32>
    %127 = vector.shape_cast %126 : vector<16xf32> to vector<16x1xf32>
    %128 = tpu.reciprocal %127 {approx = true} : vector<16x1xf32> -> vector<16x1xf32>
    %129 = vector.broadcast %128 : vector<16x1xf32> to vector<16x16xf32>
    %130 = arith.mulf %125, %129 : vector<16x16xf32>
    %cst_53 = arith.constant dense<0.000000e+00> : vector<16x8xf32>
    %131 = tpu.matmul %130, %116, %cst_53 {dimension_numbers = #tpu.dot_dimension_numbers<[1], [0], [0], [1], [0, 0, 1, 1], [], []>} : vector<16x16xf32>, vector<16x8xf32>, vector<16x8xf32> -> vector<16x8xf32>
    %132 = vector.extract_strided_slice %20 {offsets = [0, 16], sizes = [10, 8], strides = [1, 1]} : vector<10x32xf32> to vector<10x8xf32>
    %cst_54 = arith.constant dense<0.000000e+00> : vector<16x10xf32>
    %133 = tpu.matmul %114, %132, %cst_54 {dimension_numbers = #tpu.dot_dimension_numbers<[1], [1], [0], [0], [0, 0, 1, 0], [], []>} : vector<16x8xf32>, vector<10x8xf32>, vector<16x10xf32> -> vector<16x10xf32>
    %cst_55 = arith.constant 0.353553385 : f32
    %134 = vector.broadcast %cst_55 : f32 to vector<16x10xf32>
    %135 = arith.mulf %133, %134 : vector<16x10xf32>
    %cst_56 = arith.constant dense<0xFF800000> : vector<16xf32>
    %136 = vector.multi_reduction <maximumf>, %135, %cst_56 [1] : vector<16x10xf32> to vector<16xf32>
    %137 = vector.shape_cast %136 : vector<16xf32> to vector<16x1xf32>
    %138 = vector.broadcast %137 : vector<16x1xf32> to vector<16x10xf32>
    %139 = arith.subf %135, %138 : vector<16x10xf32>
    %140 = math.exp %139 : vector<16x10xf32>
    %cst_57 = arith.constant dense<0.000000e+00> : vector<16xf32>
    %141 = vector.multi_reduction <add>, %140, %cst_57 [1] : vector<16x10xf32> to vector<16xf32>
    %142 = vector.shape_cast %141 : vector<16xf32> to vector<16x1xf32>
    %143 = tpu.reciprocal %142 {approx = true} : vector<16x1xf32> -> vector<16x1xf32>
    %144 = vector.broadcast %143 : vector<16x1xf32> to vector<16x10xf32>
    %145 = arith.mulf %140, %144 : vector<16x10xf32>
    %146 = vector.extract_strided_slice %21 {offsets = [0, 16], sizes = [10, 8], strides = [1, 1]} : vector<10x32xf32> to vector<10x8xf32>
    %cst_58 = arith.constant dense<0.000000e+00> : vector<16x8xf32>
    %147 = tpu.matmul %145, %146, %cst_58 {dimension_numbers = #tpu.dot_dimension_numbers<[1], [0], [0], [1], [0, 0, 1, 1], [], []>} : vector<16x10xf32>, vector<10x8xf32>, vector<16x8xf32> -> vector<16x8xf32>
    %c0_59 = arith.constant 0 : index
    %c2 = arith.constant 2 : index
    %148 = memref.load %arg12[%c0_59, %c2] : memref<1x4xf32, #tpu.memory_space<smem>>
    %149 = vector.broadcast %148 : f32 to vector<16x8xf32>
    %150 = arith.mulf %149, %147 : vector<16x8xf32>
    %151 = arith.addf %131, %150 : vector<16x8xf32>
    %c0_60 = arith.constant 0 : index
    %c16 = arith.constant 16 : index
    %152 = vector.load %arg16[%c0_60, %c16] : memref<16x32xf32, #tpu.memory_space<vmem>>, vector<16x8xf32>
    tpu.vector_store %arg16[%c0_60, %c16], %151 {strides = array<i32>} : memref<16x32xf32, #tpu.memory_space<vmem>>, vector<16x8xf32>,
    %153 = vector.extract_strided_slice %32 {offsets = [0, 24], sizes = [16, 8], strides = [1, 1]} : vector<16x32xf32> to vector<16x8xf32>
    %154 = vector.extract_strided_slice %33 {offsets = [0, 24], sizes = [16, 8], strides = [1, 1]} : vector<16x32xf32> to vector<16x8xf32>
    %155 = vector.extract_strided_slice %34 {offsets = [0, 24], sizes = [16, 8], strides = [1, 1]} : vector<16x32xf32> to vector<16x8xf32>
    %cst_61 = arith.constant dense<0.000000e+00> : vector<16x16xf32>
    %156 = tpu.matmul %153, %154, %cst_61 {dimension_numbers = #tpu.dot_dimension_numbers<[1], [1], [0], [0], [0, 0, 1, 0], [], []>} : vector<16x8xf32>, vector<16x8xf32>, vector<16x16xf32> -> vector<16x16xf32>
    %cst_62 = arith.constant 0.353553385 : f32
    %157 = vector.broadcast %cst_62 : f32 to vector<16x16xf32>
    %158 = arith.mulf %156, %157 : vector<16x16xf32>
    %159 = arith.addf %158, %35 : vector<16x16xf32>
    %cst_63 = arith.constant dense<0xFF800000> : vector<16xf32>
    %160 = vector.multi_reduction <maximumf>, %159, %cst_63 [1] : vector<16x16xf32> to vector<16xf32>
    %161 = vector.shape_cast %160 : vector<16xf32> to vector<16x1xf32>
    %162 = vector.broadcast %161 : vector<16x1xf32> to vector<16x16xf32>
    %163 = arith.subf %159, %162 : vector<16x16xf32>
    %164 = math.exp %163 : vector<16x16xf32>
    %cst_64 = arith.constant dense<0.000000e+00> : vector<16xf32>
    %165 = vector.multi_reduction <add>, %164, %cst_64 [1] : vector<16x16xf32> to vector<16xf32>
    %166 = vector.shape_cast %165 : vector<16xf32> to vector<16x1xf32>
    %167 = tpu.reciprocal %166 {approx = true} : vector<16x1xf32> -> vector<16x1xf32>
    %168 = vector.broadcast %167 : vector<16x1xf32> to vector<16x16xf32>
    %169 = arith.mulf %164, %168 : vector<16x16xf32>
    %cst_65 = arith.constant dense<0.000000e+00> : vector<16x8xf32>
    %170 = tpu.matmul %169, %155, %cst_65 {dimension_numbers = #tpu.dot_dimension_numbers<[1], [0], [0], [1], [0, 0, 1, 1], [], []>} : vector<16x16xf32>, vector<16x8xf32>, vector<16x8xf32> -> vector<16x8xf32>
    %171 = vector.extract_strided_slice %20 {offsets = [0, 24], sizes = [10, 8], strides = [1, 1]} : vector<10x32xf32> to vector<10x8xf32>
    %cst_66 = arith.constant dense<0.000000e+00> : vector<16x10xf32>
    %172 = tpu.matmul %153, %171, %cst_66 {dimension_numbers = #tpu.dot_dimension_numbers<[1], [1], [0], [0], [0, 0, 1, 0], [], []>} : vector<16x8xf32>, vector<10x8xf32>, vector<16x10xf32> -> vector<16x10xf32>
    %cst_67 = arith.constant 0.353553385 : f32
    %173 = vector.broadcast %cst_67 : f32 to vector<16x10xf32>
    %174 = arith.mulf %172, %173 : vector<16x10xf32>
    %cst_68 = arith.constant dense<0xFF800000> : vector<16xf32>
    %175 = vector.multi_reduction <maximumf>, %174, %cst_68 [1] : vector<16x10xf32> to vector<16xf32>
    %176 = vector.shape_cast %175 : vector<16xf32> to vector<16x1xf32>
    %177 = vector.broadcast %176 : vector<16x1xf32> to vector<16x10xf32>
    %178 = arith.subf %174, %177 : vector<16x10xf32>
    %179 = math.exp %178 : vector<16x10xf32>
    %cst_69 = arith.constant dense<0.000000e+00> : vector<16xf32>
    %180 = vector.multi_reduction <add>, %179, %cst_69 [1] : vector<16x10xf32> to vector<16xf32>
    %181 = vector.shape_cast %180 : vector<16xf32> to vector<16x1xf32>
    %182 = tpu.reciprocal %181 {approx = true} : vector<16x1xf32> -> vector<16x1xf32>
    %183 = vector.broadcast %182 : vector<16x1xf32> to vector<16x10xf32>
    %184 = arith.mulf %179, %183 : vector<16x10xf32>
    %185 = vector.extract_strided_slice %21 {offsets = [0, 24], sizes = [10, 8], strides = [1, 1]} : vector<10x32xf32> to vector<10x8xf32>
    %cst_70 = arith.constant dense<0.000000e+00> : vector<16x8xf32>
    %186 = tpu.matmul %184, %185, %cst_70 {dimension_numbers = #tpu.dot_dimension_numbers<[1], [0], [0], [1], [0, 0, 1, 1], [], []>} : vector<16x10xf32>, vector<10x8xf32>, vector<16x8xf32> -> vector<16x8xf32>
    %c0_71 = arith.constant 0 : index
    %c3 = arith.constant 3 : index
    %187 = memref.load %arg12[%c0_71, %c3] : memref<1x4xf32, #tpu.memory_space<smem>>
    %188 = vector.broadcast %187 : f32 to vector<16x8xf32>
    %189 = arith.mulf %188, %186 : vector<16x8xf32>
    %190 = arith.addf %170, %189 : vector<16x8xf32>
    %c0_72 = arith.constant 0 : index
    %c24 = arith.constant 24 : index
    %191 = vector.load %arg16[%c0_72, %c24] : memref<16x32xf32, #tpu.memory_space<vmem>>, vector<16x8xf32>
    tpu.vector_store %arg16[%c0_72, %c24], %190 {strides = array<i32>} : memref<16x32xf32, #tpu.memory_space<vmem>>, vector<16x8xf32>,
    %c0_73 = arith.constant 0 : index
    %c0_74 = arith.constant 0 : index
    %192 = vector.load %arg16[%c0_73, %c0_74] : memref<16x32xf32, #tpu.memory_space<vmem>>, vector<16x32xf32>
    %c0_75 = arith.constant 0 : index
    %c0_76 = arith.constant 0 : index
    %193 = vector.load %arg4[%c0_75, %c0_76] : memref<32x32xf32, #tpu.memory_space<vmem>>, vector<32x32xf32>
    %cst_77 = arith.constant dense<0.000000e+00> : vector<16x32xf32>
    %194 = tpu.matmul %192, %193, %cst_77 {dimension_numbers = #tpu.dot_dimension_numbers<[1], [1], [0], [0], [0, 0, 1, 0], [], []>} : vector<16x32xf32>, vector<32x32xf32>, vector<16x32xf32> -> vector<16x32xf32>
    %195 = arith.addf %0, %194 : vector<16x32xf32>
    %196 = arith.mulf %195, %195 : vector<16x32xf32>
    %cst_78 = arith.constant dense<0.000000e+00> : vector<16xf32>
    %197 = vector.multi_reduction <add>, %196, %cst_78 [1] : vector<16x32xf32> to vector<16xf32>
    %198 = vector.shape_cast %197 : vector<16xf32> to vector<16x1xf32>
    %cst_79 = arith.constant 3.200000e+01 : f32
    %199 = vector.broadcast %cst_79 : f32 to vector<16x1xf32>
    %200 = arith.divf %198, %199 : vector<16x1xf32>
    %cst_80 = arith.constant 9.99999974E-6 : f32
    %201 = vector.broadcast %cst_80 : f32 to vector<16x1xf32>
    %202 = arith.addf %200, %201 : vector<16x1xf32>
    %203 = math.rsqrt %202 : vector<16x1xf32>
    %204 = vector.broadcast %203 : vector<16x1xf32> to vector<16x32xf32>
    %205 = arith.mulf %195, %204 : vector<16x32xf32>
    %c0_81 = arith.constant 0 : index
    %c0_82 = arith.constant 0 : index
    %206 = vector.load %arg2[%c0_81, %c0_82] : memref<1x32xf32, #tpu.memory_space<vmem>>, vector<1x32xf32>
    %207 = vector.broadcast %206 : vector<1x32xf32> to vector<16x32xf32>
    %208 = arith.mulf %205, %207 : vector<16x32xf32>
    %c0_83 = arith.constant 0 : index
    %c0_84 = arith.constant 0 : index
    %209 = vector.load %arg10[%c0_83, %c0_84] : memref<512x32xf32, #tpu.memory_space<vmem>>, vector<512x32xf32>
    %cst_85 = arith.constant dense<0.000000e+00> : vector<16x512xf32>
    %210 = tpu.matmul %208, %209, %cst_85 {dimension_numbers = #tpu.dot_dimension_numbers<[1], [1], [0], [0], [0, 0, 1, 0], [], []>} : vector<16x32xf32>, vector<512x32xf32>, vector<16x512xf32> -> vector<16x512xf32>
    %211 = vector.extract_strided_slice %210 {offsets = [0, 0], sizes = [16, 256], strides = [1, 1]} : vector<16x512xf32> to vector<16x256xf32>
    %212 = vector.extract_strided_slice %210 {offsets = [0, 256], sizes = [16, 256], strides = [1, 1]} : vector<16x512xf32> to vector<16x256xf32>
    %213 = arith.negf %211 : vector<16x256xf32>
    %214 = math.exp %213 : vector<16x256xf32>
    %cst_86 = arith.constant 1.000000e+00 : f32
    %215 = vector.broadcast %cst_86 : f32 to vector<16x256xf32>
    %216 = arith.addf %215, %214 : vector<16x256xf32>
    %217 = arith.divf %215, %216 : vector<16x256xf32>
    %218 = arith.mulf %211, %217 : vector<16x256xf32>
    %219 = arith.mulf %218, %212 : vector<16x256xf32>
    %c0_87 = arith.constant 0 : index
    %c0_88 = arith.constant 0 : index
    %220 = vector.load %arg11[%c0_87, %c0_88] : memref<32x256xf32, #tpu.memory_space<vmem>>, vector<32x256xf32>
    %cst_89 = arith.constant dense<0.000000e+00> : vector<16x32xf32>
    %221 = tpu.matmul %219, %220, %cst_89 {dimension_numbers = #tpu.dot_dimension_numbers<[1], [1], [0], [0], [0, 0, 1, 0], [], []>} : vector<16x256xf32>, vector<32x256xf32>, vector<16x32xf32> -> vector<16x32xf32>
    %222 = arith.addf %195, %221 : vector<16x32xf32>
    %c0_90 = arith.constant 0 : index
    %c0_91 = arith.constant 0 : index
    %223 = vector.load %arg13[%c0_90, %c0_91] : memref<16x32xf32, #tpu.memory_space<vmem>>, vector<16x32xf32>
    tpu.vector_store %arg13[%c0_90, %c0_91], %222 {strides = array<i32>} : memref<16x32xf32, #tpu.memory_space<vmem>>, vector<16x32xf32>,
    return
  }
}

</mosaic_0001>

<bundles_post_ra>
// kernel: tpu_custom_call.1
= control target key start
LH: loop header
LB: loop body
LE: loop exit
PB: predicated region body
PF: predicated region fallthrough
CT: control target
= control target key end

     0   :  { %21 = vsyncpa [#allocation5], 0  ;;  %s4536_s0 = inlined_call_operand.vmem [shape: f32[16,32], index: 0, kind: input, shape index: {}]   ;;  %s4537_s1 = inlined_call_operand.vmem [shape: f32[1,32], index: 1, kind: input, shape index: {}]   ;;  %s4538_s2 = inlined_call_operand.vmem [shape: f32[1,32], index: 2, kind: input, shape index: {}]   ;;  %s4539_s3 = inlined_call_operand.vmem [shape: f32[96,32], index: 3, kind: input, shape index: {}]   ;;  %s4540_s4 = inlined_call_operand.vmem [shape: f32[32,32], index: 4, kind: input, shape index: {}]   ;;  %s4541_s5 = inlined_call_operand.vmem [shape: f32[10,32], index: 5, kind: input, shape index: {}]   ;;  %s4542_s6 = inlined_call_operand.vmem [shape: f32[16,64], index: 6, kind: input, shape index: {}]   ;;  %s4543_s7 = inlined_call_operand.vmem [shape: f32[16,64], index: 7, kind: input, shape index: {}]   ;;  %s4544_s8 = inlined_call_operand.vmem [shape: f32[64,64], index: 8, kind: input, shape index: {}]   ;;  %s4545_s9 = inlined_call_operand.vmem [shape: f32[16,16], index: 9, kind: input, shape index: {}]   ;;  %s4546_s10 = inlined_call_operand.vmem [shape: f32[512,32], index: 10, kind: input, shape index: {}]   ;;  %s4547_s11 = inlined_call_operand.vmem [shape: f32[32,256], index: 11, kind: input, shape index: {}]   ;;  %s4548_s12 = inlined_call_operand.vmem [shape: f32[1,4], index: 12, kind: input, shape index: {}]   ;;  %s4549_s13 = inlined_call_operand.hbm [shape: f32[16,32], index: 13, kind: output, shape index: {0}]   ;;  %s4550_s14 = inlined_call_operand.hbm [shape: f32[10,32], index: 14, kind: output, shape index: {1}]   ;;  %s4551_s15 = inlined_call_operand.hbm [shape: f32[10,32], index: 15, kind: output, shape index: {2}]  }
   0x1   :  { %22 = vsyncpa [#allocation4], 0 }
   0x2   :  { %23 = vsyncpa [#allocation8], 0  ;;  %s54_s20 = sshll.u32 %s4548_s12, 4  ;;  %s55_s20 = int_to_ptr.vmem [resolvable:$true] %s54_s20 }
   0x3   :  { %s3637_s21 = scalar_lea.vmem %s55_s20, 16  ;;  %p3642_p1 = scmp.lt.s32.totalorder %s55_s20, %s55_s20 }
   0x4   :  { %p3638_p0 = scmp.ne.s32.totalorder %s55_s20, %s3637_s21  ;;  %p3643_p2 = scmp.lt.s32.totalorder %s3637_s21, %s3637_s21 }
   0x6   :  { %p3644_p3 = por %p3643_p2, %p3642_p1 }
   0x8   :  { %p3645_p4 = pnand %p3644_p3, %p3638_p0 }
   0xa   :  { %3648 = shalt.err (!%p3645_p4)
}
   0xb   :  { %s3721_s22 = smov [#allocation3]  }
   0xc   :  { %57 = dma.vmem_to_smem %s55_s20, 16, %s3721_s22, [#allocation5]  }
   0xd   :  { %3715 = dma.done.wait [#allocation5], 16  }
   0xe   :  { %3716 = vsyncadd [#allocation5], 4294967280 }
   0xf   :  { %61 = sfence }
  0x10   :  { %v3827_v0 = vld [vmem:[%s4536_s0] sm:$0xff]  ;;  %vm66_vm0 = vcmask 261120   ;;  %v3832_v1 = vld [vmem:[%s4536_s0 + $0x8] sm:$0xff]  ;;  %v95_v7 = vld [vmem:[%s4539_s3 + $0x10] sm:$0xff]  ;;  %vm269_vm2 = vcmask 523264   ;;  %vm247_vm3 = vcmask 254976  }
  0x11   :  { %v93_v2 = vld [vmem:[%s4539_s3] sm:$0xff]  ;;  %v64_v3 = vmul.f32 %v3827_v0, %v3827_v0  ;;  %vm3841_vm1 = vmpackc.low %vm66_vm0, %vm66_vm0  ;;  %v65_v5 = vmul.f32 %v3832_v1, %v3832_v1  ;;  %v94_v6 = vld [vmem:[%s4539_s3 + $0x8] sm:$0xff]  ;;  %vm365_vm4 = vcmask 64512   ;;  %vm557_vm6 = vcmask 80896   ;;  %s3723_s30 = smov 64   ;;  %s3724_s16 = smov 88  }
  0x12   :  { %v3201_v8 = vpack.c.bf16 %v94_v6, %v93_v2  ;;  %v96_v9 = vld [vmem:[%s4539_s3 + $0x18] sm:$0xff]  ;;  %v97_v13 = vld [vmem:[%s4539_s3 + $0x20] sm:$0xff]  ;;  %v98_v14 = vld [vmem:[%s4539_s3 + $0x28] sm:$0xff]  ;;  %vm453_vm7 = vcmask 130048   ;;  %vm586_vm8 = vcmask 1041408   ;;  %vm3725_vm9 = vmmov 1  }
  0x13   :  { %v67_v10 = vsel %vm66_vm0, %v64_v3, 0.0  ;;  %v3207_v11 = vpack.c.bf16 %v96_v9, %v95_v7  ;;  %v70_v12 = vsel %vm66_vm0, %v65_v5, 0.0  ;;  %v3213_v15 = vpack.c.bf16 %v98_v14, %v97_v13  ;;  %v99_v16 = vld [vmem:[%s4539_s3 + $0x30] sm:$0xff]  ;;  %v100_v17 = vld [vmem:[%s4539_s3 + $0x38] sm:$0xff]  ;;  %v101_v19 = vld [vmem:[%s4539_s3 + $0x40] sm:$0xff]  ;;  %s664_s17 = sld [smem:[#allocation3]] }
  0x14   :  { %68 = vadd.xlane.f32.xlu0 %v67_v10  ;;  %3203 = vmatprep.subr.msk.bf16.mxu0 %vm3841_vm1, %v3201_v8  ;;  %v3219_v18 = vpack.c.bf16 %v100_v17, %v99_v16  ;;  %v102_v20 = vld [vmem:[%s4539_s3 + $0x48] sm:$0xff]  ;;  %v103_v22 = vld [vmem:[%s4539_s3 + $0x50] sm:$0xff]  ;;  %v104_v23 = vld [vmem:[%s4539_s3 + $0x58] sm:$0xff]  ;;  %s3727_s18 = smov 56   ;;  %s3728_s19 = smov 80   ;;  %vm1168_vm11 = vcmask 130112  }
  0x15   :  { %3206 = vmatpush3.bf16.xpose.msk.msra.mxu0 %vm3841_vm1, %v3201_v8  ;;  %v3225_v21 = vpack.c.bf16 %v102_v20, %v101_v19  ;;  %v3231_v24 = vpack.c.bf16 %v104_v23, %v103_v22  ;;  %v261_v25 = vld [vmem:[%s4544_s8] sm:$0xff]  ;;  %v262_v26 = vld [vmem:[%s4544_s8 + $0x8] sm:$0xff]  ;;  %v263_v27 = vld [vmem:[%s4544_s8 + $0x10] sm:$0xff]  ;;  %s2751_s20 = sld [smem:[#allocation3 + $0x1]]  ;;  %s3730_s21 = smov 48   ;;  %vm1582_vm12 = vcmask 195712  }
  0x16   :  { %3209 = vmatprep.subr.msk.bf16.mxu0 %vm3841_vm1, %v3207_v11  ;;  %v3237_v28 = vpack.c.bf16 %v262_v26, %v261_v25  ;;  %v264_v29 = vld [vmem:[%s4544_s8 + $0x18] sm:$0xff]  ;;  %v265_v31 = vld [vmem:[%s4544_s8 + $0x20] sm:$0xff]  ;;  %v266_v32 = vld [vmem:[%s4544_s8 + $0x28] sm:$0xff]  ;;  %s3731_s22 = smov 72   ;;  %s3733_s23 = smov 40   ;;  %vm1996_vm13 = vcmask 261312  }
  0x17   :  { %v3241_v30 = vpack.c.bf16 %v264_v29, %v263_v27  ;;  %v3245_v33 = vpack.c.bf16 %v266_v32, %v265_v31  ;;  %v267_v34 = vld [vmem:[%s4544_s8 + $0x30] sm:$0xff]  ;;  %v268_v35 = vld [vmem:[%s4544_s8 + $0x38] sm:$0xff]  ;;  %v2708_v44 = vld [vmem:[%s4537_s1] ss:$0 sm:$0xff]  ;;  %s3722_s1 = smov 96   ;;  %s3729_s8 = smov 112  }
  0x18   :  { %71 = vadd.xlane.f32.xlu0 %v70_v12  ;;  %3238 = vmatprep.subr.bf16.mxu1 %v3237_v28  ;;  %v3249_v36 = vpack.c.bf16 %v268_v35, %v267_v34  ;;  %v91_v50 = vld [vmem:[%s4541_s5] sm:$0xff]  ;;  %v92_v51 = vld [vmem:[%s4541_s5 + $0x8] sm:$0x3]  ;;  %vm3979_vm5 = vmpackc.low %vm365_vm4, %vm365_vm4  ;;  %s2765_s5 = sld [smem:[#allocation3 + $0x2]]  ;;  %s3734_s24 = smov 8  }
  0x19   :  { %3240 = vmatpush3.bf16.msra.mxu1 %v3237_v28  ;;  %v258_v58 = vld [vmem:[%s4542_s6 + $0x8] sm:$0xff]  ;;  %v257_v60 = vld [vmem:[%s4542_s6] sm:$0xff]  ;;  %vm4019_vm10 = vmpackc.low %vm586_vm8, %vm3725_vm9  ;;  %s3735_s3 = smov 16   ;;  %s2779_s6 = sld [smem:[#allocation3 + $0x3]] }
  0x1a   :  { %3242 = vmatprep.subr.bf16.mxu1 %v3241_v30  ;;  %v352_v59 = vld [vmem:[%s4543_s7 + $0x8] sm:$0xff]  ;;  %v351_v61 = vld [vmem:[%s4543_s7] sm:$0xff] }
  0x1b   :  { %v4001_v22 = vld [vmem:[%s4545_s9] sm:$0xff]  ;;  %v4009_v28 = vld [vmem:[%s4545_s9 + $0x8] sm:$0xff]  ;;  %s3726_s9 = smov 120  }
  0x1d   :  { %3212 = vmatpush3.bf16.xpose.msk.msra.mxu0 %vm3841_vm1, %v3207_v11  ;;  %3244 = vmatpush3.bf16.msra.mxu1 %v3241_v30 }
  0x1e   :  { %3215 = vmatprep.subr.msk.bf16.mxu0 %vm3841_vm1, %v3213_v15  ;;  %3246 = vmatprep.subr.bf16.mxu1 %v3245_v33 }
  0x21   :  { %3248 = vmatpush3.bf16.msra.mxu1 %v3245_v33 }
  0x22   :  { %3250 = vmatprep.subr.bf16.mxu1 %v3249_v36 }
  0x25   :  { %3218 = vmatpush3.bf16.xpose.msk.msra.mxu0 %vm3841_vm1, %v3213_v15  ;;  %3252 = vmatpush3.bf16.msra.mxu1 %v3249_v36 }
  0x26   :  { %3221 = vmatprep.subr.msk.bf16.mxu0 %vm3841_vm1, %v3219_v18 }
  0x2d   :  { %3224 = vmatpush3.bf16.xpose.msk.msra.mxu0 %vm3841_vm1, %v3219_v18 }
  0x2e   :  { %3227 = vmatprep.subr.msk.bf16.mxu0 %vm3841_vm1, %v3225_v21 }
  0x35   :  { %3230 = vmatpush3.bf16.xpose.msk.msra.mxu0 %vm3841_vm1, %v3225_v21 }
  0x36   :  { %3233 = vmatprep.subr.msk.bf16.mxu0 %vm3841_vm1, %v3231_v24 }
  0x3d   :  { %3236 = vmatpush3.bf16.xpose.msk.msra.mxu0 %vm3841_vm1, %v3231_v24 }
  0xa1   :  { %v69_v37 = vpop.xlane.xlu0 %68 }
  0xa2   :  { %v74_v38 = vmul.f32 0.03125, %v69_v37 }
  0xa4   :  { %v76_v39 = vadd.f32 1e-05, %v74_v38 }
  0xa5   :  { %v72_v40 = vpop.xlane.xlu0 %71 }
  0xa6   :  { %3547 = vrsqrt.f32 %v76_v39  ;;  %v75_v41 = vmul.f32 0.03125, %v72_v40 }
  0xa8   :  { %v77_v42 = vadd.f32 1e-05, %v75_v41 }
  0xaa   :  { %3549 = vrsqrt.f32 %v77_v42 }
  0xb0   :  { %v3548_v43 = vpop.eup %3547 }
  0xb1   :  { %v80_v45 = vmul.f32 %v3548_v43, %v3827_v0 }
  0xb3   :  { %v89_v46 = vmul.f32 %v2708_v44, %v80_v45 }
  0xb4   :  { %v3550_v47 = vpop.eup %3549 }
  0xb5   :  { %v81_v48 = vmul.f32 %v3550_v47, %v3832_v1  ;;  %3053 = vmatprep.mubr.msk.f32.mxu0 %vm66_vm0, %v89_v46  ;;  %v2002_v46 = vld [vmem:[%s4540_s4 + $0x8] sm:$0xff] }
  0xb7   :  { %v90_v49 = vmul.f32 %v2708_v44, %v81_v48 }
  0xb9   :  { %3054 = vmatmul.mubr.msk.f32.vlgmr.msra.gmra.mrb[0].mxu0 %vm66_vm0, %v90_v49 }
  0xba   :  { %3056 = vmatprep.mubr.msk.f32.mxu0 %vm66_vm0, %v91_v50 }
  0xbd   :  { %3057 = vmatmul.mubr.msk.f32.gmra.mrb[2].mxu0 %vm66_vm0, %v92_v51 }
 0x18c   :  { %v3055_v52 = vpop.f32.mrb[0].mxu0 }
 0x18d   :  { %v219_v53 = vpop.f32.mrb[1].mxu0  ;;  %v260_v0 = vmul.f32 %v3055_v52, %v258_v58 }
 0x18e   :  { %3075 = vmatprep.mubr.msk.f32.mxu1 %vm269_vm2, %v219_v53  ;;  %v3945_v54 = vpack.i.bf16 %v3055_v52, %v219_v53  ;;  %v259_v3 = vmul.f32 %v257_v60, %v219_v53 }
 0x18f   :  { %3076 = vmatmul.mubr.msk.f32.vlgmr.msra.gmra.mrb[0].mxu1 %vm269_vm2, %v3055_v52 }
 0x190   :  { %v3058_v55 = vpop.f32.mrb[2].mxu0 }
 0x191   :  { %v3947_v56 = vpop.f32.mrb[3].mxu0  ;;  %242 = vrot.lane.b32.xlu0 %v3058_v55, %s3722_s1 }
 0x192   :  { %v3950_v57 = vpack.i.bf16 %v3058_v55, %v3947_v56 }
 0x203   :  { %v243_v63 = vpop.permute.xlu0 %242 }
 0x204   :  { %248 = vst.msk [vmem:[#allocation7 + $0x8] sm:$0x3] %vm247_vm3, %v243_v63 }
 0x262   :  { %v3077_v62 = vpop.f32.mrb[0].mxu1 }
 0x263   :  { %v354_v1 = vmul.f32 %v3077_v62, %v352_v59  ;;  %v342_v2 = vpop.f32.mrb[1].mxu1 }
 0x264   :  { %v353_v5 = vmul.f32 %v351_v61, %v342_v2 }
 0x265   :  { %v3965_v6 = vadd.f32 %v354_v1, %v260_v0 }
 0x266   :  { %v3967_v7 = vadd.f32 %v353_v5, %v259_v3 }
 0x268   :  { %3082 = vmatprep.mubr.msk.f32.mxu1 %vm365_vm4, %v3967_v7  ;;  %v3973_v8 = vpack.i.bf16 %v3965_v6, %v3967_v7 }
 0x26a   :  { %3478 = vrot.lane.b32.xlu1 %v3973_v8, %s3722_s1 }
 0x26e   :  { %240 = vrot.lane.b32.xlu1 %v3947_v56, %s3722_s1  ;;  %s3732_s1 = smov 104  }
 0x2dc   :  { %v3479_v9 = vpop.permute.xlu1 %3478 }
 0x2dd   :  { %v3481_v10 = vunpack.i.h.bf16 %v3479_v9  ;;  %v3480_v11 = vunpack.i.l.bf16 %v3479_v9 }
 0x2df   :  { %v3253_v13 = vpack.c.bf16 %v3481_v10, %v3480_v11 }
 0x2e0   :  { %v241_v14 = vpop.permute.xlu1 %240 }
 0x2e1   :  { %3255 = vmatprep.subr.msk.bf16.mxu1 %vm3979_vm5, %v3253_v13  ;;  %246 = vst.msk [vmem:[#allocation7] sm:$0xff] %vm66_vm0, %v241_v14  ;;  %v3259_v15 = vpack.c.bf16 %v243_v63, %v241_v14 }
 0x2e2   :  { %3258 = vmatpush3.bf16.xpose.msk.msra.mxu1 %vm3979_vm5, %v3253_v13 }
 0x2e3   :  { %3261 = vmatprep.subr.msk.bf16.mxu1 %vm3979_vm5, %v3259_v15 }
 0x2e9   :  { %3083 = vmatmul.mubr.msk.f32.vlgmr.msra.gmra.mrb[2].mxu1 %vm365_vm4, %v3965_v6 }
 0x2ea   :  { %3264 = vmatpush3.bf16.xpose.msk.msra.mxu1 %vm3979_vm5, %v3259_v15  ;;  %3089 = vmatprep.mubr.msk.f32.mxu1 %vm365_vm4, %v3967_v7 }
 0x2f1   :  { %3090 = vmatmul.mubr.msk.f32.vlgmr.msra.gmra.mrb[4].mxu1 %vm365_vm4, %v3965_v6 }
 0x3bc   :  { %v3084_v16 = vpop.f32.mrb[2].mxu1 }
 0x3bd   :  { %v440_v17 = vpop.f32.mrb[3].mxu1  ;;  %v450_v25 = vmul.f32 0.35355338, %v3084_v16 }
 0x3be   :  { %v449_v18 = vmul.f32 0.35355338, %v440_v17 }
 0x3bf   :  { %v452_v30 = vadd.f32 %v450_v25, %v4009_v28 }
 0x3c0   :  { %v451_v27 = vadd.f32 %v449_v18, %v4001_v22 }
 0x3c1   :  { %v457_v31 = vsel %vm453_vm7, %v452_v30, -inf }
 0x3c2   :  { %v454_v29 = vsel %vm453_vm7, %v451_v27, -inf }
 0x3c4   :  { %v3091_v19 = vpop.f32.mrb[4].mxu1 }
 0x3c5   :  { %v556_v20 = vmul.f32 0.35355338, %v3091_v19  ;;  %v546_v21 = vpop.f32.mrb[5].mxu1 }
 0x3c6   :  { %v555_v23 = vmul.f32 0.35355338, %v546_v21 }
 0x3c7   :  { %v561_v24 = vsel %vm557_vm6, %v556_v20, -inf }
 0x3c8   :  { %562 = vmax.xlane.f32.xlu0 %v561_v24  ;;  %v558_v26 = vsel %vm557_vm6, %v555_v23, -inf }
 0x3c9   :  { %559 = vmax.xlane.f32.xlu1 %v558_v26 }
 0x3cd   :  { %455 = vmax.xlane.f32.xlu1 %v454_v29 }
 0x3d1   :  { %458 = vmax.xlane.f32.xlu1 %v457_v31 }
 0x3de   :  { %251 = vrot.lane.b32.xlu0 %v3058_v55, %s3723_s30 }
 0x3e2   :  { %3493 = vrot.lane.b32.xlu0 %v3973_v8, %s3724_s16  ;;  %249 = vrot.lane.b32.xlu1 %v3947_v56, %s3723_s30 }
 0x3e6   :  { %3483 = vrot.lane.b32.xlu1 %v3945_v54, %s3723_s30 }
 0x3ea   :  { %3488 = vrot.lane.b32.xlu1 %v3950_v57, %s3724_s16  ;;  %s3736_s16 = smov 24  }
 0x455   :  { %v563_v32 = vpop.xlane.xlu0 %562 }
 0x456   :  { %v560_v33 = vpop.xlane.xlu1 %559  ;;  %v565_v34 = vsub.f32 %v556_v20, %v563_v32 }
 0x457   :  { %v564_v39 = vsub.f32 %v555_v23, %v560_v33 }
 0x458   :  { %v568_v38 = vmul.f32 1.442695, %v565_v34  ;;  %v665_v34 = vstv %s664_s17 }
 0x459   :  { %v252_v35 = vpop.permute.xlu0 %251  ;;  %v566_v43 = vmul.f32 1.442695, %v564_v39 }
 0x45a   :  { %256 = vst.msk [vmem:[#allocation9 + $0x8] sm:$0x3] %vm247_vm3, %v252_v35  ;;  %v456_v36 = vpop.xlane.xlu1 %455 }
 0x45b   :  { %v460_v37 = vsub.f32 %v451_v27, %v456_v36 }
 0x45d   :  { %v462_v40 = vmul.f32 1.442695, %v460_v37  ;;  %v3494_v3 = vpop.permute.xlu0 %3493 }
 0x45e   :  { %v459_v41 = vpop.xlane.xlu1 %458  ;;  %v3496_v17 = vunpack.i.h.bf16 %v3494_v3  ;;  %v3495_v18 = vunpack.i.l.bf16 %v3494_v3 }
 0x45f   :  { %3551 = vpow2.f32 %v462_v40  ;;  %v461_v42 = vsub.f32 %v452_v30, %v459_v41 }
 0x460   :  { %3553 = vpow2.f32 %v568_v38  ;;  %v3275_v24 = vpack.c.bf16 %v3496_v17, %v3495_v18 }
 0x461   :  { %v464_v44 = vmul.f32 1.442695, %v461_v42 }
 0x462   :  { %v250_v45 = vpop.permute.xlu1 %249 }
 0x463   :  { %3555 = vpow2.f32 %v464_v44  ;;  %255 = vst.msk [vmem:[#allocation9] sm:$0xff] %vm66_vm0, %v250_v45  ;;  %v3265_v47 = vpack.c.bf16 %v252_v35, %v250_v45 }
 0x464   :  { %3557 = vpow2.f32 %v566_v43 }
 0x465   :  { %3267 = vmatprep.subr.msk.bf16.mxu1 %vm4019_vm10, %v3265_v47 }
 0x466   :  { %3270 = vmatpush3.bf16.msk.msra.mxu1 %vm4019_vm10, %v3265_v47  ;;  %v3484_v48 = vpop.permute.xlu1 %3483 }
 0x467   :  { %v3486_v49 = vunpack.i.h.bf16 %v3484_v48  ;;  %v3485_v50 = vunpack.i.l.bf16 %v3484_v48 }
 0x469   :  { %v3552_v51 = vpop.eup %3551  ;;  %v3271_v52 = vpack.c.bf16 %v3486_v49, %v3485_v50 }
 0x46a   :  { %v3489_v53 = vpop.permute.xlu1 %3488  ;;  %v466_v55 = vsel %vm453_vm7, %v3552_v51, 0.0  ;;  %v3554_v56 = vpop.eup %3553 }
 0x46b   :  { %v3491_v58 = vunpack.i.h.bf16 %v3489_v53  ;;  %v3490_v59 = vunpack.i.l.bf16 %v3489_v53  ;;  %467 = vadd.xlane.f32.xlu1 %v466_v55  ;;  %3272 = vmatprep.subr.bf16.mxu1 %v3271_v52  ;;  %v573_v62 = vsel %vm557_vm6, %v3554_v56, 0.0 }
 0x46d   :  { %v3556_v60 = vpop.eup %3555  ;;  %v3281_v61 = vpack.c.bf16 %v3491_v58, %v3490_v59 }
 0x46e   :  { %v469_v63 = vsel %vm453_vm7, %v3556_v60, 0.0  ;;  %v3558_v0 = vpop.eup %3557 }
 0x46f   :  { %574 = vadd.xlane.f32.xlu1 %v573_v62  ;;  %470 = vadd.xlane.f32.xlu0 %v469_v63  ;;  %v570_v1 = vsel %vm557_vm6, %v3558_v0, 0.0 }
 0x470   :  { %3283 = vmatprep.subr.msk.bf16.mxu0 %vm3979_vm5, %v3281_v61 }
 0x471   :  { %3286 = vmatpush3.bf16.xpose.msk.msra.mxu0 %vm3979_vm5, %v3281_v61 }
 0x473   :  { %571 = vadd.xlane.f32.xlu1 %v570_v1 }
 0x484   :  { %757 = vrot.lane.b32.xlu1 %v3967_v7, %s3726_s9 }
 0x485   :  { %759 = vrot.lane.b32.xlu0 %v3965_v6, %s3726_s9 }
 0x4f8   :  { %v468_v2 = vpop.xlane.xlu1 %467 }
 0x4f9   :  { %3559 = vrcp.f32 %v468_v2 }
 0x4fc   :  { %v575_v5 = vpop.xlane.xlu1 %574  ;;  %v471_v9 = vpop.xlane.xlu0 %470 }
 0x4fd   :  { %3561 = vrcp.f32 %v575_v5 }
 0x500   :  { %v572_v10 = vpop.xlane.xlu1 %571  ;;  %v760_v13 = vpop.permute.xlu0 %759 }
 0x501   :  { %3563 = vrcp.f32 %v572_v10 }
 0x502   :  { %3565 = vrcp.f32 %v471_v9 }
 0x503   :  { %v3560_v14 = vpop.eup %3559 }
 0x504   :  { %v758_v11 = vpop.permute.xlu1 %757  ;;  %v474_v23 = vmul.f32 %v3560_v14, %v3552_v51 }
 0x505   :  { %3117 = vmatprep.mubr.msk.f32.mxu0 %vm365_vm4, %v758_v11 }
 0x506   :  { %3118 = vmatmul.mubr.msk.f32.vlgmr.msra.gmra.mrb[4].mxu0 %vm365_vm4, %v760_v13 }
 0x507   :  { %v3562_v15 = vpop.eup %3561 }
 0x508   :  { %v579_v20 = vmul.f32 %v3562_v15, %v3554_v56 }
 0x50b   :  { %v3564_v16 = vpop.eup %3563 }
 0x50c   :  { %v578_v19 = vmul.f32 %v3564_v16, %v3558_v0  ;;  %v3566_v21 = vpop.eup %3565 }
 0x50d   :  { %v475_v25 = vmul.f32 %v3566_v21, %v3556_v60 }
 0x50e   :  { %3096 = vmatprep.mubr.msk.f32.mxu1 %vm557_vm6, %v578_v19 }
 0x50f   :  { %3097 = vmatmul.mubr.msk.f32.vlgmr.msra.gmra.mrb[6].mxu1 %vm557_vm6, %v579_v20 }
 0x510   :  { %3274 = vmatpush3.bf16.msra.mxu1 %v3271_v52  ;;  %3103 = vmatprep.mubr.msk.f32.mxu1 %vm453_vm7, %v474_v23 }
 0x511   :  { %3277 = vmatprep.subr.msk.bf16.mxu1 %vm3979_vm5, %v3275_v24 }
 0x513   :  { %3104 = vmatmul.mubr.msk.f32.vlgmr.msra.gmra.mrb[8].mxu1 %vm453_vm7, %v475_v25 }
 0x514   :  { %3110 = vmatprep.mubr.msk.f32.mxu1 %vm365_vm4, %v758_v11 }
 0x519   :  { %3280 = vmatpush3.bf16.xpose.msk.msra.mxu1 %vm3979_vm5, %v3275_v24 }
 0x520   :  { %3111 = vmatmul.mubr.msk.f32.vlgmr.msra.gmra.mrb[10].mxu1 %vm365_vm4, %v760_v13 }
 0x5d9   :  { %v3119_v26 = vpop.f32.mrb[4].mxu0 }
 0x5da   :  { %v958_v27 = vmul.f32 0.35355338, %v3119_v26  ;;  %v948_v29 = vpop.f32.mrb[5].mxu0 }
 0x5db   :  { %v957_v30 = vmul.f32 0.35355338, %v948_v29 }
 0x5dc   :  { %v962_v31 = vsel %vm557_vm6, %v958_v27, -inf }
 0x5dd   :  { %963 = vmax.xlane.f32.xlu0 %v962_v31  ;;  %v959_v32 = vsel %vm557_vm6, %v957_v30, -inf }
 0x5de   :  { %960 = vmax.xlane.f32.xlu1 %v959_v32 }
 0x5e2   :  { %v3098_v33 = vpop.f32.mrb[6].mxu1 }
 0x5e3   :  { %v655_v35 = vpop.f32.mrb[7].mxu1  ;;  %v667_v36 = vmul.f32 %v3098_v33, %v665_v34 }
 0x5e4   :  { %v666_v37 = vmul.f32 %v665_v34, %v655_v35 }
 0x5e6   :  { %v3105_v38 = vpop.f32.mrb[8].mxu1 }
 0x5e7   :  { %v752_v39 = vadd.f32 %v3105_v38, %v667_v36  ;;  %v746_v40 = vpop.f32.mrb[9].mxu1 }
 0x5e8   :  { %v747_v41 = vadd.f32 %v746_v40, %v666_v37 }
 0x5e9   :  { %756 = vst.msk [vmem:[#allocation2 + $0x8] sm:$0xff] %vm365_vm4, %v752_v39 }
 0x5ea   :  { %755 = vst.msk [vmem:[#allocation2] sm:$0xff] %vm365_vm4, %v747_v41 }
 0x5f3   :  { %v3112_v42 = vpop.f32.mrb[10].mxu1 }
 0x5f4   :  { %v849_v43 = vmul.f32 0.35355338, %v3112_v42  ;;  %v839_v44 = vpop.f32.mrb[11].mxu1 }
 0x5f5   :  { %v848_v45 = vmul.f32 0.35355338, %v839_v44 }
 0x5f6   :  { %v851_v47 = vadd.f32 %v849_v43, %v4009_v28 }
 0x5f7   :  { %v850_v48 = vadd.f32 %v848_v45, %v4001_v22 }
 0x5f8   :  { %v855_v49 = vsel %vm453_vm7, %v851_v47, -inf }
 0x5f9   :  { %856 = vmax.xlane.f32.xlu1 %v855_v49  ;;  %v852_v50 = vsel %vm453_vm7, %v850_v48, -inf }
 0x5fa   :  { %853 = vmax.xlane.f32.xlu0 %v852_v50 }
 0x66a   :  { %v964_v51 = vpop.xlane.xlu0 %963 }
 0x66b   :  { %v966_v52 = vsub.f32 %v958_v27, %v964_v51  ;;  %v961_v53 = vpop.xlane.xlu1 %960 }
 0x66c   :  { %v965_v55 = vsub.f32 %v957_v30, %v961_v53 }
 0x66d   :  { %v969_v56 = vmul.f32 1.442695, %v966_v52  ;;  %v1070_v52 = vstv %s2751_s20 }
 0x66e   :  { %v967_v58 = vmul.f32 1.442695, %v965_v55 }
 0x66f   :  { %3567 = vpow2.f32 %v969_v56 }
 0x670   :  { %3569 = vpow2.f32 %v967_v58 }
 0x679   :  { %v3568_v59 = vpop.eup %3567 }
 0x67a   :  { %v3570_v60 = vpop.eup %3569  ;;  %v974_v61 = vsel %vm557_vm6, %v3568_v59, 0.0 }
 0x67b   :  { %975 = vadd.xlane.f32.xlu1 %v974_v61  ;;  %v971_v62 = vsel %vm557_vm6, %v3570_v60, 0.0 }
 0x67c   :  { %972 = vadd.xlane.f32.xlu0 %v971_v62 }
 0x686   :  { %v857_v0 = vpop.xlane.xlu1 %856 }
 0x687   :  { %v854_v63 = vpop.xlane.xlu0 %853  ;;  %v859_v2 = vsub.f32 %v851_v47, %v857_v0 }
 0x688   :  { %v858_v1 = vsub.f32 %v850_v48, %v854_v63 }
 0x689   :  { %v862_v5 = vmul.f32 1.442695, %v859_v2 }
 0x68a   :  { %v860_v3 = vmul.f32 1.442695, %v858_v1 }
 0x68c   :  { %3503 = vrot.lane.b32.xlu1 %v3945_v54, %s3727_s18  ;;  %3571 = vpow2.f32 %v860_v3 }
 0x68d   :  { %3573 = vpow2.f32 %v862_v5 }
 0x690   :  { %3508 = vrot.lane.b32.xlu1 %v3973_v8, %s3728_s19 }
 0x692   :  { %3498 = vrot.lane.b32.xlu0 %v3950_v57, %s3727_s18 }
 0x696   :  { %v3572_v9 = vpop.eup %3571 }
 0x697   :  { %v3574_v10 = vpop.eup %3573  ;;  %v864_v11 = vsel %vm453_vm7, %v3572_v9, 0.0 }
 0x698   :  { %v867_v13 = vsel %vm453_vm7, %v3574_v10, 0.0 }
 0x6b1   :  { %865 = vadd.xlane.f32.xlu0 %v864_v11 }
 0x6b4   :  { %868 = vadd.xlane.f32.xlu1 %v867_v13 }
 0x6c5   :  { %1171 = vrot.lane.b32.xlu1 %v3967_v7, %s3729_s8 }
 0x6c7   :  { %3513 = vrot.lane.b32.xlu0 %v3950_v57, %s3728_s19 }
 0x6cb   :  { %1173 = vrot.lane.b32.xlu0 %v3965_v6, %s3729_s8 }
 0x708   :  { %v976_v14 = vpop.xlane.xlu1 %975 }
 0x709   :  { %3575 = vrcp.f32 %v976_v14  ;;  %v973_v15 = vpop.xlane.xlu0 %972 }
 0x70a   :  { %3577 = vrcp.f32 %v973_v15 }
 0x70c   :  { %v3504_v16 = vpop.permute.xlu1 %3503 }
 0x70d   :  { %v3499_v17 = vpop.permute.xlu0 %3498  ;;  %v3506_v18 = vunpack.i.h.bf16 %v3504_v16  ;;  %v3505_v19 = vunpack.i.l.bf16 %v3504_v16 }
 0x70e   :  { %v3501_v20 = vunpack.i.h.bf16 %v3499_v17  ;;  %v3500_v21 = vunpack.i.l.bf16 %v3499_v17 }
 0x70f   :  { %v3293_v27 = vpack.c.bf16 %v3506_v18, %v3505_v19 }
 0x710   :  { %v3287_v23 = vpack.c.bf16 %v3501_v20, %v3500_v21  ;;  %v3509_v24 = vpop.permute.xlu1 %3508 }
 0x711   :  { %v3511_v25 = vunpack.i.h.bf16 %v3509_v24  ;;  %v3510_v26 = vunpack.i.l.bf16 %v3509_v24 }
 0x712   :  { %3289 = vmatprep.subr.msk.bf16.mxu1 %vm4019_vm10, %v3287_v23 }
 0x713   :  { %v3576_v29 = vpop.eup %3575  ;;  %v3297_v30 = vpack.c.bf16 %v3511_v25, %v3510_v26  ;;  %3292 = vmatpush3.bf16.msk.msra.mxu1 %vm4019_vm10, %v3287_v23 }
 0x714   :  { %v3578_v31 = vpop.eup %3577  ;;  %3294 = vmatprep.subr.bf16.mxu1 %v3293_v27  ;;  %v980_v33 = vmul.f32 %v3576_v29, %v3568_v59 }
 0x715   :  { %3299 = vmatprep.subr.msk.bf16.mxu0 %vm3979_vm5, %v3297_v30  ;;  %v979_v32 = vmul.f32 %v3578_v31, %v3570_v60 }
 0x716   :  { %3302 = vmatpush3.bf16.xpose.msk.msra.mxu0 %vm3979_vm5, %v3297_v30 }
 0x717   :  { %3124 = vmatprep.mubr.msk.f32.mxu1 %vm557_vm6, %v979_v32 }
 0x718   :  { %3125 = vmatmul.mubr.msk.f32.vlgmr.msra.gmra.mrb[12].mxu1 %vm557_vm6, %v980_v33 }
 0x719   :  { %3296 = vmatpush3.bf16.msra.mxu1 %v3293_v27 }
 0x73e   :  { %v866_v34 = vpop.xlane.xlu0 %865 }
 0x73f   :  { %3579 = vrcp.f32 %v866_v34 }
 0x741   :  { %v869_v35 = vpop.xlane.xlu1 %868 }
 0x742   :  { %3581 = vrcp.f32 %v869_v35  ;;  %v3514_v36 = vpop.permute.xlu0 %3513 }
 0x743   :  { %v3516_v37 = vunpack.i.h.bf16 %v3514_v36  ;;  %v3515_v38 = vunpack.i.l.bf16 %v3514_v36 }
 0x745   :  { %v3303_v39 = vpack.c.bf16 %v3516_v37, %v3515_v38  ;;  %v1172_v40 = vpop.permute.xlu1 %1171 }
 0x746   :  { %3138 = vmatprep.mubr.msk.f32.mxu0 %vm365_vm4, %v1172_v40  ;;  %v1174_v41 = vpop.permute.xlu0 %1173 }
 0x747   :  { %3139 = vmatmul.mubr.msk.f32.vlgmr.msra.gmra.mrb[6].mxu0 %vm365_vm4, %v1174_v41  ;;  %3305 = vmatprep.subr.msk.bf16.mxu1 %vm3979_vm5, %v3303_v39 }
 0x749   :  { %v3580_v42 = vpop.eup %3579 }
 0x74a   :  { %v872_v43 = vmul.f32 %v3580_v42, %v3572_v9 }
 0x74c   :  { %v3582_v44 = vpop.eup %3581  ;;  %3131 = vmatprep.mubr.msk.f32.mxu1 %vm453_vm7, %v872_v43 }
 0x74d   :  { %v873_v45 = vmul.f32 %v3582_v44, %v3574_v10 }
 0x74f   :  { %3132 = vmatmul.mubr.msk.f32.vlgmr.msra.gmra.mrb[14].mxu1 %vm453_vm7, %v873_v45 }
 0x750   :  { %3308 = vmatpush3.bf16.xpose.msk.msra.mxu1 %vm3979_vm5, %v3303_v39  ;;  %3145 = vmatprep.mubr.msk.f32.mxu1 %vm365_vm4, %v1172_v40 }
 0x757   :  { %3146 = vmatmul.mubr.msk.f32.vlgmr.msra.gmra.mrb[16].mxu1 %vm365_vm4, %v1174_v41 }
 0x7eb   :  { %v3126_v47 = vpop.f32.mrb[12].mxu1 }
 0x7ec   :  { %v1060_v48 = vpop.f32.mrb[13].mxu1  ;;  %v1072_v56 = vmul.f32 %v3126_v47, %v1070_v52 }
 0x7ed   :  { %v1071_v58 = vmul.f32 %v1070_v52, %v1060_v48 }
 0x81a   :  { %v3140_v49 = vpop.f32.mrb[6].mxu0 }
 0x81b   :  { %v1253_v50 = vpop.f32.mrb[7].mxu0  ;;  %v1263_v63 = vmul.f32 0.35355338, %v3140_v49 }
 0x81c   :  { %v1262_v51 = vmul.f32 0.35355338, %v1253_v50 }
 0x81d   :  { %v1265_v10 = vadd.f32 %v1263_v63, %v4009_v28 }
 0x81e   :  { %v1264_v53 = vadd.f32 %v1262_v51, %v4001_v22 }
 0x81f   :  { %v1269_v11 = vsel %vm453_vm7, %v1265_v10, -inf }
 0x820   :  { %v1266_v55 = vsel %vm453_vm7, %v1264_v53, -inf }
 0x821   :  { %1267 = vmax.xlane.f32.xlu1 %v1266_v55 }
 0x822   :  { %v3133_v59 = vpop.f32.mrb[14].mxu1 }
 0x823   :  { %v4090_v60 = vadd.f32 %v3133_v59, %v1072_v56  ;;  %v1151_v61 = vpop.f32.mrb[15].mxu1 }
 0x824   :  { %v4092_v62 = vadd.f32 %v1151_v61, %v1071_v58 }
 0x82a   :  { %v3147_v0 = vpop.f32.mrb[16].mxu1 }
 0x82b   :  { %v1372_v1 = vmul.f32 0.35355338, %v3147_v0  ;;  %v1362_v2 = vpop.f32.mrb[17].mxu1 }
 0x82c   :  { %v1371_v3 = vmul.f32 0.35355338, %v1362_v2 }
 0x82d   :  { %v1376_v5 = vsel %vm557_vm6, %v1372_v1, -inf }
 0x82e   :  { %1377 = vmax.xlane.f32.xlu1 %v1376_v5  ;;  %v1373_v9 = vsel %vm557_vm6, %v1371_v3, -inf }
 0x82f   :  { %1374 = vmax.xlane.f32.xlu0 %v1373_v9 }
 0x833   :  { %1270 = vmax.xlane.f32.xlu0 %v1269_v11 }
 0x83f   :  { %3523 = vrot.lane.b32.xlu1 %v3945_v54, %s3730_s21 }
 0x843   :  { %3528 = vrot.lane.b32.xlu1 %v3973_v8, %s3731_s22 }
 0x8ae   :  { %v1268_v13 = vpop.xlane.xlu1 %1267 }
 0x8af   :  { %v1272_v14 = vsub.f32 %v1264_v53, %v1268_v13 }
 0x8b1   :  { %v1274_v15 = vmul.f32 1.442695, %v1272_v14 }
 0x8b3   :  { %3583 = vpow2.f32 %v1274_v15 }
 0x8bb   :  { %v1378_v16 = vpop.xlane.xlu1 %1377 }
 0x8bc   :  { %v1380_v17 = vsub.f32 %v1372_v1, %v1378_v16  ;;  %v1375_v18 = vpop.xlane.xlu0 %1374 }
 0x8bd   :  { %v3584_v19 = vpop.eup %3583  ;;  %v1379_v20 = vsub.f32 %v1371_v3, %v1375_v18  ;;  %v1484_v3 = vstv %s2765_s5 }
 0x8be   :  { %v1383_v21 = vmul.f32 1.442695, %v1380_v17  ;;  %v1278_v23 = vsel %vm453_vm7, %v3584_v19, 0.0 }
 0x8bf   :  { %v1381_v24 = vmul.f32 1.442695, %v1379_v20  ;;  %v3524_v25 = vpop.permute.xlu1 %3523  ;;  %1279 = vadd.xlane.f32.xlu0 %v1278_v23 }
 0x8c0   :  { %3585 = vpow2.f32 %v1383_v21  ;;  %v3526_v26 = vunpack.i.h.bf16 %v3524_v25  ;;  %v3525_v27 = vunpack.i.l.bf16 %v3524_v25  ;;  %v1271_v29 = vpop.xlane.xlu0 %1270 }
 0x8c1   :  { %v1273_v8 = vsub.f32 %v1265_v10, %v1271_v29  ;;  %3587 = vpow2.f32 %v1381_v24 }
 0x8c2   :  { %v3315_v30 = vpack.c.bf16 %v3526_v26, %v3525_v27 }
 0x8c3   :  { %v1276_v31 = vmul.f32 1.442695, %v1273_v8  ;;  %v3529_v39 = vpop.permute.xlu1 %3528 }
 0x8c4   :  { %3316 = vmatprep.subr.bf16.mxu1 %v3315_v30  ;;  %v3531_v45 = vunpack.i.h.bf16 %v3529_v39  ;;  %v3530_v47 = vunpack.i.l.bf16 %v3529_v39 }
 0x8c5   :  { %3589 = vpow2.f32 %v1276_v31  ;;  %3318 = vmatpush3.bf16.msra.mxu1 %v3315_v30 }
 0x8c6   :  { %v3319_v52 = vpack.c.bf16 %v3531_v45, %v3530_v47 }
 0x8ca   :  { %v3586_v32 = vpop.eup %3585 }
 0x8cb   :  { %v1388_v33 = vsel %vm557_vm6, %v3586_v32, 0.0  ;;  %v3588_v34 = vpop.eup %3587 }
 0x8cc   :  { %1389 = vadd.xlane.f32.xlu1 %v1388_v33  ;;  %v1385_v36 = vsel %vm557_vm6, %v3588_v34, 0.0 }
 0x8cf   :  { %v3590_v35 = vpop.eup %3589 }
 0x8d0   :  { %1386 = vadd.xlane.f32.xlu1 %v1385_v36  ;;  %v1281_v37 = vsel %vm453_vm7, %v3590_v35, 0.0 }
 0x8d1   :  { %1282 = vadd.xlane.f32.xlu0 %v1281_v37 }
 0x8e1   :  { %1585 = vrot.lane.b32.xlu1 %v3967_v7, %s3732_s1 }
 0x8e7   :  { %3518 = vrot.lane.b32.xlu0 %v3950_v57, %s3730_s21 }
 0x8eb   :  { %3533 = vrot.lane.b32.xlu0 %v3950_v57, %s3731_s22 }
 0x8ef   :  { %1587 = vrot.lane.b32.xlu0 %v3965_v6, %s3732_s1 }
 0x94c   :  { %v1280_v38 = vpop.xlane.xlu0 %1279 }
 0x94d   :  { %3591 = vrcp.f32 %v1280_v38 }
 0x957   :  { %v3592_v40 = vpop.eup %3591 }
 0x958   :  { %v1286_v41 = vmul.f32 %v3592_v40, %v3584_v19 }
 0x959   :  { %v1390_v42 = vpop.xlane.xlu1 %1389 }
 0x95a   :  { %3159 = vmatprep.mubr.msk.f32.mxu1 %vm453_vm7, %v1286_v41  ;;  %3593 = vrcp.f32 %v1390_v42 }
 0x95d   :  { %v1387_v43 = vpop.xlane.xlu1 %1386 }
 0x95e   :  { %3595 = vrcp.f32 %v1387_v43  ;;  %v1283_v7 = vpop.xlane.xlu0 %1282 }
 0x95f   :  { %3597 = vrcp.f32 %v1283_v7 }
 0x961   :  { %v1586_v1 = vpop.permute.xlu1 %1585 }
 0x962   :  { %v3519_v44 = vpop.permute.xlu0 %3518 }
 0x963   :  { %v3521_v48 = vunpack.i.h.bf16 %v3519_v44  ;;  %v3520_v49 = vunpack.i.l.bf16 %v3519_v44 }
 0x964   :  { %v3594_v51 = vpop.eup %3593 }
 0x965   :  { %v3309_v50 = vpack.c.bf16 %v3521_v48, %v3520_v49  ;;  %v1394_v63 = vmul.f32 %v3594_v51, %v3586_v32 }
 0x966   :  { %v3534_v6 = vpop.permute.xlu0 %3533 }
 0x967   :  { %v3536_v53 = vunpack.i.h.bf16 %v3534_v6  ;;  %v3535_v55 = vunpack.i.l.bf16 %v3534_v6  ;;  %3311 = vmatprep.subr.msk.bf16.mxu0 %vm4019_vm10, %v3309_v50 }
 0x968   :  { %v3596_v56 = vpop.eup %3595  ;;  %3314 = vmatpush3.bf16.msk.msra.mxu0 %vm4019_vm10, %v3309_v50 }
 0x969   :  { %v3598_v58 = vpop.eup %3597  ;;  %v3325_v59 = vpack.c.bf16 %v3536_v53, %v3535_v55  ;;  %3321 = vmatprep.subr.msk.bf16.mxu0 %vm3979_vm5, %v3319_v52  ;;  %v1393_v61 = vmul.f32 %v3596_v56, %v3588_v34 }
 0x96a   :  { %v1287_v0 = vmul.f32 %v3598_v58, %v3590_v35  ;;  %v1588_v2 = vpop.permute.xlu0 %1587 }
 0x96b   :  { %3152 = vmatprep.mubr.msk.f32.mxu0 %vm557_vm6, %v1393_v61  ;;  %3327 = vmatprep.subr.msk.bf16.mxu1 %vm3979_vm5, %v3325_v59 }
 0x96c   :  { %3153 = vmatmul.mubr.msk.f32.vlgmr.msra.gmra.mrb[8].mxu0 %vm557_vm6, %v1394_v63  ;;  %3160 = vmatmul.mubr.msk.f32.vlgmr.msra.gmra.mrb[18].mxu1 %vm453_vm7, %v1287_v0 }
 0x96d   :  { %3330 = vmatpush3.bf16.xpose.msk.msra.mxu1 %vm3979_vm5, %v3325_v59  ;;  %3166 = vmatprep.mubr.msk.f32.mxu0 %vm365_vm4, %v1586_v1 }
 0x96e   :  { %3173 = vmatprep.mubr.msk.f32.mxu1 %vm365_vm4, %v1586_v1 }
 0x971   :  { %3324 = vmatpush3.bf16.xpose.msk.msra.mxu0 %vm3979_vm5, %v3319_v52 }
 0x974   :  { %3174 = vmatmul.mubr.msk.f32.vlgmr.msra.gmra.mrb[20].mxu1 %vm365_vm4, %v1588_v2 }
 0x978   :  { %3167 = vmatmul.mubr.msk.f32.vlgmr.msra.gmra.mrb[10].mxu0 %vm365_vm4, %v1588_v2 }
 0xa3f   :  { %v3154_v5 = vpop.f32.mrb[8].mxu0  ;;  %v3161_v9 = vpop.f32.mrb[18].mxu1 }
 0xa40   :  { %v1486_v10 = vmul.f32 %v3154_v5, %v1484_v3  ;;  %v1474_v11 = vpop.f32.mrb[9].mxu0  ;;  %v1565_v13 = vpop.f32.mrb[19].mxu1 }
 0xa41   :  { %v1485_v14 = vmul.f32 %v1484_v3, %v1474_v11 }
 0xa42   :  { %v1571_v15 = vadd.f32 %v3161_v9, %v1486_v10 }
 0xa43   :  { %v1566_v16 = vadd.f32 %v1565_v13, %v1485_v14  ;;  %v2001_v13 = vld [vmem:[%s4540_s4] sm:$0xff] }
 0xa44   :  { %v3341_v14 = vpack.c.bf16 %v2002_v46, %v2001_v13  ;;  %v2163_v13 = vld [vmem:[%s4546_s10 + $0x130] sm:$0xff]  ;;  %v2164_v46 = vld [vmem:[%s4546_s10 + $0x138] sm:$0xff] }
 0xa47   :  { %v3175_v17 = vpop.f32.mrb[20].mxu1 }
 0xa48   :  { %v1786_v18 = vmul.f32 0.35355338, %v3175_v17  ;;  %v1776_v19 = vpop.f32.mrb[21].mxu1 }
 0xa49   :  { %v1785_v12 = vmul.f32 0.35355338, %v1776_v19 }
 0xa4a   :  { %v1790_v20 = vsel %vm557_vm6, %v1786_v18, -inf }
 0xa4b   :  { %1791 = vmax.xlane.f32.xlu0 %v1790_v20  ;;  %v1787_v21 = vsel %vm557_vm6, %v1785_v12, -inf  ;;  %v3168_v23 = vpop.f32.mrb[10].mxu0 }
 0xa4c   :  { %1788 = vmax.xlane.f32.xlu1 %v1787_v21  ;;  %v1677_v24 = vmul.f32 0.35355338, %v3168_v23  ;;  %v1667_v25 = vpop.f32.mrb[11].mxu0 }
 0xa4d   :  { %v1676_v26 = vmul.f32 0.35355338, %v1667_v25 }
 0xa4e   :  { %v1679_v27 = vadd.f32 %v1677_v24, %v4009_v28 }
 0xa4f   :  { %v1678_v29 = vadd.f32 %v1676_v26, %v4001_v22 }
 0xa50   :  { %v1683_v8 = vsel %vm453_vm7, %v1679_v27, -inf }
 0xa51   :  { %1684 = vmax.xlane.f32.xlu1 %v1683_v8  ;;  %v1680_v30 = vsel %vm453_vm7, %v1678_v29, -inf }
 0xa52   :  { %1681 = vmax.xlane.f32.xlu0 %v1680_v30 }
 0xad8   :  { %v1792_v31 = vpop.xlane.xlu0 %1791 }
 0xad9   :  { %v1794_v32 = vsub.f32 %v1786_v18, %v1792_v31  ;;  %v1789_v33 = vpop.xlane.xlu1 %1788  ;;  %v1898_v18 = vstv %s2779_s6  ;;  %v2141_v31 = vld [vmem:[%s4546_s10 + $0x80] sm:$0xff] }
 0xada   :  { %v1793_v34 = vsub.f32 %v1785_v12, %v1789_v33  ;;  %v2173_v33 = vld [vmem:[%s4546_s10 + $0x180] sm:$0xff] }
 0xadb   :  { %v1797_v35 = vmul.f32 1.442695, %v1794_v32  ;;  %v2142_v32 = vld [vmem:[%s4546_s10 + $0x88] sm:$0xff] }
 0xadc   :  { %v1795_v36 = vmul.f32 1.442695, %v1793_v34  ;;  %v3353_v34 = vpack.c.bf16 %v2142_v32, %v2141_v31 }
 0xadd   :  { %3599 = vpow2.f32 %v1797_v35  ;;  %v2174_v35 = vld [vmem:[%s4546_s10 + $0x188] sm:$0xff] }
 0xade   :  { %3601 = vpow2.f32 %v1795_v36  ;;  %v1685_v37 = vpop.xlane.xlu1 %1684  ;;  %v2125_v36 = vld [vmem:[%s4546_s10] sm:$0xff] }
 0xadf   :  { %v1687_v38 = vsub.f32 %v1679_v27, %v1685_v37  ;;  %v1682_v39 = vpop.xlane.xlu0 %1681  ;;  %v2126_v37 = vld [vmem:[%s4546_s10 + $0x8] sm:$0xff] }
 0xae0   :  { %v1686_v28 = vsub.f32 %v1678_v29, %v1682_v39  ;;  %v3356_v39 = vpack.c.bf16 %v2126_v37, %v2125_v36  ;;  %v2167_v36 = vld [vmem:[%s4546_s10 + $0x150] sm:$0xff]  ;;  %v2168_v37 = vld [vmem:[%s4546_s10 + $0x158] sm:$0xff] }
 0xae1   :  { %v1690_v40 = vmul.f32 1.442695, %v1687_v38  ;;  %v3401_v38 = vpack.c.bf16 %v2174_v35, %v2173_v33  ;;  %v2136_v35 = vld [vmem:[%s4546_s10 + $0x58] sm:$0xff] }
 0xae2   :  { %v1688_v22 = vmul.f32 1.442695, %v1686_v28  ;;  %v2157_v28 = vld [vmem:[%s4546_s10 + $0x100] sm:$0xff] }
 0xae3   :  { %3603 = vpow2.f32 %v1690_v40  ;;  %v2158_v40 = vld [vmem:[%s4546_s10 + $0x108] sm:$0xff] }
 0xae4   :  { %3605 = vpow2.f32 %v1688_v22  ;;  %v2143_v22 = vld [vmem:[%s4546_s10 + $0x90] sm:$0xff] }
 0xae7   :  { %v3600_v41 = vpop.eup %3599 }
 0xae8   :  { %v3602_v42 = vpop.eup %3601  ;;  %v1802_v43 = vsel %vm557_vm6, %v3600_v41, 0.0 }
 0xae9   :  { %1803 = vadd.xlane.f32.xlu1 %v1802_v43  ;;  %v1799_v7 = vsel %vm557_vm6, %v3602_v42, 0.0  ;;  %v2175_v43 = vld [vmem:[%s4546_s10 + $0x190] sm:$0xff] }
 0xaea   :  { %1800 = vadd.xlane.f32.xlu0 %v1799_v7  ;;  %v2176_v7 = vld [vmem:[%s4546_s10 + $0x198] sm:$0xff] }
 0xaed   :  { %v3604_v44 = vpop.eup %3603 }
 0xaee   :  { %v3606_v45 = vpop.eup %3605  ;;  %v1695_v47 = vsel %vm453_vm7, %v3604_v44, 0.0 }
 0xaef   :  { %1696 = vadd.xlane.f32.xlu1 %v1695_v47  ;;  %v1692_v48 = vsel %vm453_vm7, %v3606_v45, 0.0  ;;  %v2127_v47 = vld [vmem:[%s4546_s10 + $0x10] sm:$0xff] }
 0xaf0   :  { %1693 = vadd.xlane.f32.xlu0 %v1692_v48  ;;  %v2128_v48 = vld [vmem:[%s4546_s10 + $0x18] sm:$0xff] }
 0xb00   :  { %3543 = vrot.lane.b32.xlu1 %v3945_v54, %s3733_s23 }
 0xb04   :  { %1162 = vrot.lane.b32.xlu1 %v4092_v62, %s3734_s24 }
 0xb06   :  { %3538 = vrot.lane.b32.xlu0 %v3950_v57, %s3733_s23 }
 0xb08   :  { %1576 = vrot.lane.b32.xlu1 %v1566_v16, %s3735_s3  ;;  %v2004_v16 = vld [vmem:[%s4540_s4 + $0x18] sm:$0xff] }
 0xb0a   :  { %1164 = vrot.lane.b32.xlu0 %v4090_v60, %s3734_s24 }
 0xb0e   :  { %1578 = vrot.lane.b32.xlu0 %v1571_v15, %s3735_s3  ;;  %v2003_v15 = vld [vmem:[%s4540_s4 + $0x10] sm:$0xff] }
 0xb0f   :  { %v3347_v17 = vpack.c.bf16 %v2004_v16, %v2003_v15  ;;  %v2150_v15 = vld [vmem:[%s4546_s10 + $0xc8] sm:$0xff]  ;;  %v2181_v16 = vld [vmem:[%s4546_s10 + $0x1c0] sm:$0xff] }
 0xb76   :  { %v1804_v50 = vpop.xlane.xlu1 %1803 }
 0xb77   :  { %v1801_v49 = vpop.xlane.xlu0 %1800 }
 0xb78   :  { %3607 = vrcp.f32 %v1801_v49  ;;  %v2159_v49 = vld [vmem:[%s4546_s10 + $0x110] sm:$0xff] }
 0xb79   :  { %3609 = vrcp.f32 %v1804_v50  ;;  %v2160_v50 = vld [vmem:[%s4546_s10 + $0x118] sm:$0xff] }
 0xb7c   :  { %v1697_v6 = vpop.xlane.xlu1 %1696 }
 0xb7d   :  { %3611 = vrcp.f32 %v1697_v6  ;;  %v1694_v51 = vpop.xlane.xlu0 %1693  ;;  %v2145_v6 = vld [vmem:[%s4546_s10 + $0xa0] sm:$0xff] }
 0xb7e   :  { %3613 = vrcp.f32 %v1694_v51  ;;  %v2146_v51 = vld [vmem:[%s4546_s10 + $0xa8] sm:$0xff] }
 0xb80   :  { %v3544_v54 = vpop.permute.xlu1 %3543 }
 0xb81   :  { %v3546_v52 = vunpack.i.h.bf16 %v3544_v54  ;;  %v3545_v53 = vunpack.i.l.bf16 %v3544_v54  ;;  %v3539_v62 = vpop.permute.xlu0 %3538  ;;  %v2177_v54 = vld [vmem:[%s4546_s10 + $0x1a0] sm:$0xff] }
 0xb82   :  { %v3608_v55 = vpop.eup %3607  ;;  %v3541_v57 = vunpack.i.h.bf16 %v3539_v62  ;;  %v3540_v56 = vunpack.i.l.bf16 %v3539_v62  ;;  %v3410_v62 = vpack.c.bf16 %v2160_v50, %v2159_v49  ;;  %v2154_v49 = vld [vmem:[%s4546_s10 + $0xe8] sm:$0xff]  ;;  %v2185_v50 = vld [vmem:[%s4546_s10 + $0x1e0] sm:$0xff] }
 0xb83   :  { %v3337_v58 = vpack.c.bf16 %v3546_v52, %v3545_v53  ;;  %v1807_v59 = vmul.f32 %v3608_v55, %v3602_v42  ;;  %v3610_v63 = vpop.eup %3609  ;;  %v2144_v42 = vld [vmem:[%s4546_s10 + $0x98] sm:$0xff]  ;;  %v2178_v52 = vld [vmem:[%s4546_s10 + $0x1a8] sm:$0xff]  ;;  %v3362_v53 = vpack.c.bf16 %v2128_v48, %v2127_v47  ;;  %v3365_v55 = vpack.c.bf16 %v2146_v51, %v2145_v6  ;;  %v2153_v48 = vld [vmem:[%s4546_s10 + $0xe0] sm:$0xff] }
 0xb84   :  { %v3331_v60 = vpack.c.bf16 %v3541_v57, %v3540_v56  ;;  %v1163_v61 = vpop.permute.xlu1 %1162  ;;  %v1808_v3 = vmul.f32 %v3610_v63, %v3600_v41  ;;  %v3404_v41 = vpack.c.bf16 %v2158_v40, %v2157_v28  ;;  %v3413_v57 = vpack.c.bf16 %v2178_v52, %v2177_v54  ;;  %v2129_v56 = vld [vmem:[%s4546_s10 + $0x20] sm:$0xff]  ;;  %v2148_v63 = vld [vmem:[%s4546_s10 + $0xb8] sm:$0xff]  ;;  %v3635_v40 = vld [vmem:[%s4536_s0 + $0x8] sm:$0xff] }
 0xb85   :  { %3180 = vmatprep.mubr.msk.f32.mxu0 %vm557_vm6, %v1807_v59  ;;  %1169 = vst.msk [vmem:[#allocation2] sm:$0xff] %vm1168_vm11, %v1163_v61  ;;  %3338 = vmatprep.subr.bf16.mxu1 %v3337_v58  ;;  %v1165_v0 = vpop.permute.xlu0 %1164  ;;  %v2161_v59 = vld [vmem:[%s4546_s10 + $0x120] sm:$0xff]  ;;  %v2147_v61 = vld [vmem:[%s4546_s10 + $0xb0] sm:$0xff]  ;;  %v3389_v6 = vpack.c.bf16 %v2154_v49, %v2153_v48  ;;  %v2186_v51 = vld [vmem:[%s4546_s10 + $0x1e8] sm:$0xff] }
 0xb86   :  { %1170 = vst.msk [vmem:[#allocation2 + $0x8] sm:$0xff] %vm1168_vm11, %v1165_v0  ;;  %3333 = vmatprep.subr.msk.bf16.mxu0 %vm4019_vm10, %v3331_v60  ;;  %3340 = vmatpush3.bf16.msra.mxu1 %v3337_v58  ;;  %v2130_v58 = vld [vmem:[%s4546_s10 + $0x28] sm:$0xff]  ;;  %v2179_v0 = vld [vmem:[%s4546_s10 + $0x1b0] sm:$0xff]  ;;  %v2137_v54 = vld [vmem:[%s4546_s10 + $0x60] sm:$0xff] }
 0xb87   :  { %v3612_v1 = vpop.eup %3611  ;;  %3336 = vmatpush3.bf16.msk.msra.mxu0 %vm4019_vm10, %v3331_v60  ;;  %3355 = vmatprep.subr.msk.bf16.mxu1 %vm3841_vm1, %v3353_v34  ;;  %v2162_v60 = vld [vmem:[%s4546_s10 + $0x128] sm:$0xff]  ;;  %v2135_v34 = vld [vmem:[%s4546_s10 + $0x50] sm:$0xff] }
 0xb88   :  { %v3614_v2 = vpop.eup %3613  ;;  %v1577_v5 = vpop.permute.xlu1 %1576  ;;  %v1701_v11 = vmul.f32 %v3612_v1, %v3604_v44  ;;  %3343 = vmatprep.subr.msk.bf16.mxu0 %vm3841_vm1, %v3341_v14  ;;  %v3359_v44 = vpack.c.bf16 %v2144_v42, %v2143_v22  ;;  %v2180_v1 = vld [vmem:[%s4546_s10 + $0x1b8] sm:$0xff]  ;;  %v3636_v42 = vld [vmem:[%s4536_s0] sm:$0xff]  ;;  %v2138_v52 = vld [vmem:[%s4546_s10 + $0x68] sm:$0xff] }
 0xb89   :  { %1583 = vst.msk [vmem:[#allocation2] sm:$0xff] %vm1582_vm12, %v1577_v5  ;;  %v1579_v9 = vpop.permute.xlu0 %1578  ;;  %v1700_v10 = vmul.f32 %v3614_v2, %v3606_v45  ;;  %v3407_v45 = vpack.c.bf16 %v2176_v7, %v2175_v43  ;;  %v3368_v2 = vpack.c.bf16 %v2130_v58, %v2129_v56  ;;  %v3371_v5 = vpack.c.bf16 %v2148_v63, %v2147_v61  ;;  %v2155_v56 = vld [vmem:[%s4546_s10 + $0xf0] sm:$0xff]  ;;  %v2188_v61 = vld [vmem:[%s4546_s10 + $0x1f8] sm:$0xff] }
 0xb8a   :  { %1584 = vst.msk [vmem:[#allocation2 + $0x8] sm:$0xff] %vm1582_vm12, %v1579_v9  ;;  %3181 = vmatmul.mubr.msk.f32.vlgmr.msra.gmra.mrb[12].mxu0 %vm557_vm6, %v1808_v3  ;;  %v3416_v3 = vpack.c.bf16 %v2162_v60, %v2161_v59  ;;  %v3419_v9 = vpack.c.bf16 %v2180_v1, %v2179_v0  ;;  %v2156_v59 = vld [vmem:[%s4546_s10 + $0xf8] sm:$0xff]  ;;  %v2187_v60 = vld [vmem:[%s4546_s10 + $0x1f0] sm:$0xff] }
 0xb8b   :  { %3187 = vmatprep.mubr.msk.f32.mxu1 %vm453_vm7, %v1700_v10  ;;  %v2131_v10 = vld [vmem:[%s4546_s10 + $0x30] sm:$0xff]  ;;  %v3395_v63 = vpack.c.bf16 %v2156_v59, %v2155_v56  ;;  %v3443_v0 = vpack.c.bf16 %v2188_v61, %v2187_v60 }
 0xb8c   :  { %3188 = vmatmul.mubr.msk.f32.vlgmr.msra.gmra.mrb[22].mxu1 %vm453_vm7, %v1701_v11  ;;  %v2132_v11 = vld [vmem:[%s4546_s10 + $0x38] sm:$0xff]  ;;  %v2139_v1 = vld [vmem:[%s4546_s10 + $0x70] sm:$0xff] }
 0xb8f   :  { %3358 = vmatpush3.bf16.xpose.msk.msra.mxu1 %vm3841_vm1, %v3356_v39  ;;  %v3434_v39 = vpack.c.bf16 %v2168_v37, %v2167_v36 }
 0xb90   :  { %3346 = vmatpush3.bf16.xpose.msk.msra.mxu0 %vm3841_vm1, %v3341_v14  ;;  %3361 = vmatprep.subr.msk.bf16.mxu1 %vm3841_vm1, %v3359_v44  ;;  %v2149_v14 = vld [vmem:[%s4546_s10 + $0xc0] sm:$0xff] }
 0xb91   :  { %3349 = vmatprep.subr.msk.bf16.mxu0 %vm3841_vm1, %v3347_v17 }
 0xb97   :  { %3364 = vmatpush3.bf16.xpose.msk.msra.mxu1 %vm3841_vm1, %v3362_v53  ;;  %v3437_v53 = vpack.c.bf16 %v2186_v51, %v2185_v50 }
 0xb98   :  { %3352 = vmatpush3.bf16.xpose.msk.msra.mxu0 %vm3841_vm1, %v3347_v17  ;;  %3367 = vmatprep.subr.msk.bf16.mxu1 %vm3841_vm1, %v3365_v55  ;;  %v2182_v17 = vld [vmem:[%s4546_s10 + $0x1c8] sm:$0xff]  ;;  %v2169_v55 = vld [vmem:[%s4546_s10 + $0x160] sm:$0xff] }
 0xb99   :  { %3403 = vmatprep.subr.msk.bf16.mxu0 %vm3841_vm1, %v3401_v38  ;;  %v3386_v38 = vpack.c.bf16 %v2136_v35, %v2135_v34 }
 0xb9f   :  { %3370 = vmatpush3.bf16.xpose.msk.msra.mxu1 %vm3841_vm1, %v3368_v2  ;;  %v2140_v2 = vld [vmem:[%s4546_s10 + $0x78] sm:$0xff] }
 0xba0   :  { %3373 = vmatprep.subr.msk.bf16.mxu1 %vm3841_vm1, %v3371_v5  ;;  %v2172_v5 = vld [vmem:[%s4546_s10 + $0x178] sm:$0xff] }
 0xc5d   :  { %v3182_v19 = vpop.f32.mrb[12].mxu0 }
 0xc5e   :  { %v1900_v12 = vmul.f32 %v3182_v19, %v1898_v18  ;;  %v1888_v20 = vpop.f32.mrb[13].mxu0  ;;  %v3422_v19 = vpack.c.bf16 %v2164_v46, %v2163_v13 }
 0xc5f   :  { %v1899_v21 = vmul.f32 %v1898_v18, %v1888_v20  ;;  %v3189_v23 = vpop.f32.mrb[22].mxu1  ;;  %v3374_v18 = vpack.c.bf16 %v2132_v11, %v2131_v10  ;;  %v3425_v20 = vpack.c.bf16 %v2182_v17, %v2181_v16 }
 0xc60   :  { %v1985_v24 = vadd.f32 %v3189_v23, %v1900_v12  ;;  %v1979_v25 = vpop.f32.mrb[23].mxu1  ;;  %v3377_v12 = vpack.c.bf16 %v2150_v15, %v2149_v14  ;;  %v2134_v23 = vld [vmem:[%s4546_s10 + $0x48] sm:$0xff] }
 0xc61   :  { %v1980_v26 = vadd.f32 %v1979_v25, %v1899_v21  ;;  %3376 = vmatpush3.bf16.xpose.msk.msra.mxu1 %vm3841_vm1, %v3374_v18  ;;  %v2133_v21 = vld [vmem:[%s4546_s10 + $0x40] sm:$0xff]  ;;  %v2166_v25 = vld [vmem:[%s4546_s10 + $0x148] sm:$0xff] }
 0xc62   :  { %1992 = vrot.lane.b32.xlu0 %v1985_v24, %s3736_s16  ;;  %3379 = vmatprep.subr.msk.bf16.mxu1 %vm3841_vm1, %v3377_v12  ;;  %v2165_v24 = vld [vmem:[%s4546_s10 + $0x140] sm:$0xff] }
 0xc63   :  { %1990 = vrot.lane.b32.xlu1 %v1980_v26, %s3736_s16  ;;  %v2151_v26 = vld [vmem:[%s4546_s10 + $0xd0] sm:$0xff]  ;;  %v3428_v31 = vpack.c.bf16 %v2166_v25, %v2165_v24  ;;  %v2576_v24 = vld [vmem:[%s4547_s11 + $0x18] sm:$0xff] }
 0xcd4   :  { %v1993_v27 = vpop.permute.xlu0 %1992 }
 0xcd5   :  { %1998 = vst.msk [vmem:[#allocation2 + $0x8] sm:$0xff] %vm1996_vm13, %v1993_v27  ;;  %v1991_v29 = vpop.permute.xlu1 %1990  ;;  %v2152_v27 = vld [vmem:[%s4546_s10 + $0xd8] sm:$0xff] }
 0xcd6   :  { %1997 = vst.msk [vmem:[#allocation2] sm:$0xff] %vm1996_vm13, %v1991_v29  ;;  %v2183_v29 = vld [vmem:[%s4546_s10 + $0x1d0] sm:$0xff]  ;;  %v3383_v32 = vpack.c.bf16 %v2152_v27, %v2151_v26  ;;  %v2573_v26 = vld [vmem:[%s4547_s11] sm:$0xff] }
 0xcd7   :  { %v2575_v27 = vld [vmem:[%s4547_s11 + $0x10] sm:$0xff] }
 0xcdc   :  { %v2000_v30 = vld [vmem:[#allocation2 + $0x8] sm:$0xff] }
 0xcdd   :  { %v1999_v8 = vld [vmem:[#allocation2] sm:$0xff] }
 0xcde   :  { %3198 = vmatprep.mubr.msk.f32.mxu0 %vm66_vm0, %v1999_v8  ;;  %v2184_v8 = vld [vmem:[%s4546_s10 + $0x1d8] sm:$0xff] }
 0xcdf   :  { %3199 = vmatmul.mubr.msk.f32.vlgmr.msra.gmra.mrb[14].mxu0 %vm66_vm0, %v2000_v30  ;;  %v3380_v30 = vpack.c.bf16 %v2134_v23, %v2133_v21  ;;  %v3431_v33 = vpack.c.bf16 %v2184_v8, %v2183_v29  ;;  %v2574_v23 = vld [vmem:[%s4547_s11 + $0x8] sm:$0xff]  ;;  %v3451_v29 = vpack.c.bf16 %v2575_v27, %v2573_v26 }
 0xce0   :  { %3406 = vmatpush3.bf16.xpose.msk.msra.mxu0 %vm3841_vm1, %v3404_v41  ;;  %v3449_v25 = vpack.c.bf16 %v2576_v24, %v2574_v23  ;;  %v2578_v8 = vld [vmem:[%s4547_s11 + $0x28] sm:$0xff] }
 0xce1   :  { %3409 = vmatprep.subr.msk.bf16.mxu0 %vm3841_vm1, %v3407_v45  ;;  %3382 = vmatpush3.bf16.xpose.msk.msra.mxu1 %vm3841_vm1, %v3380_v30  ;;  %v2580_v30 = vld [vmem:[%s4547_s11 + $0x38] sm:$0xff] }
 0xce2   :  { %3385 = vmatprep.subr.msk.bf16.mxu1 %vm3841_vm1, %v3383_v32  ;;  %v2577_v32 = vld [vmem:[%s4547_s11 + $0x20] sm:$0xff] }
 0xce8   :  { %3412 = vmatpush3.bf16.xpose.msk.msra.mxu0 %vm3841_vm1, %v3410_v62  ;;  %v3392_v62 = vpack.c.bf16 %v2138_v52, %v2137_v54 }
 0xce9   :  { %3415 = vmatprep.subr.msk.bf16.mxu0 %vm3841_vm1, %v3413_v57  ;;  %3388 = vmatpush3.bf16.xpose.msk.msra.mxu1 %vm3841_vm1, %v3386_v38  ;;  %v2170_v57 = vld [vmem:[%s4546_s10 + $0x168] sm:$0xff] }
 0xcea   :  { %3391 = vmatprep.subr.msk.bf16.mxu1 %vm3841_vm1, %v3389_v6  ;;  %v3440_v58 = vpack.c.bf16 %v2170_v57, %v2169_v55 }
 0xcf0   :  { %3418 = vmatpush3.bf16.xpose.msk.msra.mxu0 %vm3841_vm1, %v3416_v3  ;;  %v2171_v3 = vld [vmem:[%s4546_s10 + $0x170] sm:$0xff] }
 0xcf1   :  { %3421 = vmatprep.subr.msk.bf16.mxu0 %vm3841_vm1, %v3419_v9  ;;  %3394 = vmatpush3.bf16.xpose.msk.msra.mxu1 %vm3841_vm1, %v3392_v62  ;;  %v3398_v9 = vpack.c.bf16 %v2140_v2, %v2139_v1  ;;  %v3446_v10 = vpack.c.bf16 %v2172_v5, %v2171_v3 }
 0xcf2   :  { %3397 = vmatprep.subr.msk.bf16.mxu1 %vm3841_vm1, %v3395_v63 }
 0xcf8   :  { %3424 = vmatpush3.bf16.xpose.msk.msra.mxu0 %vm3841_vm1, %v3422_v19  ;;  %v2788_v19 = vld [vmem:[%s4538_s2] ss:$0 sm:$0xff] }
 0xcf9   :  { %3427 = vmatprep.subr.msk.bf16.mxu0 %vm3841_vm1, %v3425_v20  ;;  %3400 = vmatpush3.bf16.xpose.msk.msra.mxu1 %vm3841_vm1, %v3398_v9 }
 0xcfa   :  { %3450 = vmatprep.subr.bf16.mxu1 %v3449_v25 }
 0xd00   :  { %3430 = vmatpush3.bf16.xpose.msk.msra.mxu0 %vm3841_vm1, %v3428_v31  ;;  %v3453_v31 = vpack.c.bf16 %v2580_v30, %v2578_v8 }
 0xd01   :  { %3433 = vmatprep.subr.msk.bf16.mxu0 %vm3841_vm1, %v3431_v33  ;;  %v2579_v33 = vld [vmem:[%s4547_s11 + $0x30] sm:$0xff]  ;;  %s3737_s11 = smov [#allocation7]  }
 0xd02   :  { %v3455_v34 = vpack.c.bf16 %v2579_v33, %v2577_v32  ;;  %s2677_s22 = sshll.u32 %s3737_s11, 4  ;;  %s2678_s22 = int_to_ptr.vmem [resolvable:$true] %s2677_s22 }
 0xd03   :  { %s3649_s1 = scalar_lea.vmem %s2678_s22, 256  ;;  %p3654_p6 = scmp.lt.s32.totalorder %s2678_s22, %s2678_s22 }
 0xd04   :  { %p3650_p5 = scmp.ne.s32.totalorder %s2678_s22, %s3649_s1  ;;  %p3655_p7 = scmp.lt.s32.totalorder %s3649_s1, %s3649_s1 }
 0xd06   :  { %p3656_p8 = por %p3655_p7, %p3654_p6 }
 0xd08   :  { %3436 = vmatpush3.bf16.xpose.msk.msra.mxu0 %vm3841_vm1, %v3434_v39  ;;  %p3657_p9 = pnand %p3656_p8, %p3650_p5 }
 0xd09   :  { %3439 = vmatprep.subr.msk.bf16.mxu0 %vm3841_vm1, %v3437_v53 }
 0xd10   :  { %3442 = vmatpush3.bf16.xpose.msk.msra.mxu0 %vm3841_vm1, %v3440_v58 }
 0xd11   :  { %3445 = vmatprep.subr.msk.bf16.mxu0 %vm3841_vm1, %v3443_v0 }
 0xd18   :  { %3448 = vmatpush3.bf16.xpose.msk.msra.mxu0 %vm3841_vm1, %v3446_v10 }
 0xdb2   :  { %v3200_v28 = vpop.f32.mrb[14].mxu0 }
 0xdb3   :  { %v4373_v22 = vadd.f32 %v3635_v40, %v3200_v28  ;;  %v2089_v41 = vpop.f32.mrb[15].mxu0 }
 0xdb4   :  { %v4378_v43 = vadd.f32 %v3636_v42, %v2089_v41 }
 0xdb5   :  { %v2101_v7 = vmul.f32 %v4373_v22, %v4373_v22 }
 0xdb6   :  { %v2100_v44 = vmul.f32 %v4378_v43, %v4378_v43 }
 0xdb7   :  { %v2105_v45 = vsel %vm66_vm0, %v2101_v7, 0.0 }
 0xdb8   :  { %2106 = vadd.xlane.f32.xlu0 %v2105_v45  ;;  %v2102_v47 = vsel %vm66_vm0, %v2100_v44, 0.0 }
 0xdb9   :  { %2103 = vadd.xlane.f32.xlu1 %v2102_v47 }
 0xe45   :  { %v2107_v11 = vpop.xlane.xlu0 %2106 }
 0xe46   :  { %v2109_v13 = vmul.f32 0.03125, %v2107_v11  ;;  %v2104_v46 = vpop.xlane.xlu1 %2103 }
 0xe47   :  { %v2108_v14 = vmul.f32 0.03125, %v2104_v46 }
 0xe48   :  { %v2111_v15 = vadd.f32 1e-05, %v2109_v13 }
 0xe49   :  { %v2110_v16 = vadd.f32 1e-05, %v2108_v14 }
 0xe4a   :  { %3615 = vrsqrt.f32 %v2111_v15 }
 0xe4b   :  { %3617 = vrsqrt.f32 %v2110_v16 }
 0xe54   :  { %v3616_v17 = vpop.eup %3615 }
 0xe55   :  { %v3618_v18 = vpop.eup %3617  ;;  %v2115_v20 = vmul.f32 %v3616_v17, %v4373_v22 }
 0xe56   :  { %v2114_v12 = vmul.f32 %v3618_v18, %v4378_v43 }
 0xe57   :  { %v2124_v21 = vmul.f32 %v2788_v19, %v2115_v20 }
 0xe58   :  { %v2123_v4 = vmul.f32 %v2788_v19, %v2114_v12 }
 0xe5a   :  { %2989 = vmatprep.mubr.msk.f32.mxu1 %vm66_vm0, %v2123_v4  ;;  %3025 = vmatprep.mubr.msk.f32.mxu0 %vm66_vm0, %v2123_v4 }
 0xe5b   :  { %2990 = vmatmul.mubr.msk.f32.vlgmr.msra.gmra.mrb[24].mxu1 %vm66_vm0, %v2123_v4  ;;  %3026 = vmatmul.mubr.msk.f32.vlgmr.msra.gmra.mrb[16].mxu0 %vm66_vm0, %v2123_v4 }
 0xe5c   :  { %2991 = vmatprep.mubr.msk.f32.mxu1 %vm66_vm0, %v2124_v21  ;;  %3027 = vmatprep.mubr.msk.f32.mxu0 %vm66_vm0, %v2124_v21 }
 0xe5d   :  { %3452 = vmatpush1.bf16.xpose.msra.mxu1 %v3451_v29 }
 0xe5e   :  { %3454 = vmatprep.subr.bf16.mxu1 %v3453_v31 }
 0xe5f   :  { %2992 = vmatmul.mubr.msk.f32.gmra.mrb[26].mxu1 %vm66_vm0, %v2124_v21  ;;  %3028 = vmatmul.mubr.msk.f32.gmra.mrb[18].mxu0 %vm66_vm0, %v2124_v21 }
 0xe65   :  { %3456 = vmatpush1.bf16.xpose.msra.mxu1 %v3455_v34 }
 0xf2e   :  { %v2453_v35 = vpop.f32.mrb[24].mxu1  ;;  %v2530_v36 = vpop.f32.mrb[16].mxu0 }
 0xf2f   :  { %v2857_v37 = vmul.f32 -1.442695, %v2453_v35  ;;  %v2455_v38 = vpop.f32.mrb[25].mxu1  ;;  %v2532_v39 = vpop.f32.mrb[17].mxu0 }
 0xf30   :  { %v2858_v28 = vmul.f32 -1.442695, %v2455_v38 }
 0xf31   :  { %3619 = vpow2.f32 %v2857_v37 }
 0xf32   :  { %3621 = vpow2.f32 %v2858_v28  ;;  %v2459_v40 = vpop.f32.mrb[26].mxu1  ;;  %v2536_v41 = vpop.f32.mrb[18].mxu0 }
 0xf33   :  { %v2859_v42 = vmul.f32 -1.442695, %v2459_v40  ;;  %v2461_v7 = vpop.f32.mrb[27].mxu1  ;;  %v2538_v44 = vpop.f32.mrb[19].mxu0 }
 0xf34   :  { %v2860_v45 = vmul.f32 -1.442695, %v2461_v7 }
 0xf35   :  { %3623 = vpow2.f32 %v2859_v42 }
 0xf36   :  { %3625 = vpow2.f32 %v2860_v45 }
 0xf3b   :  { %v3620_v47 = vpop.eup %3619 }
 0xf3c   :  { %v3622_v48 = vpop.eup %3621  ;;  %v2553_v49 = vadd.f32 1.0, %v3620_v47 }
 0xf3d   :  { %v2554_v50 = vadd.f32 1.0, %v3622_v48 }
 0xf3e   :  { %3627 = vrcp.f32 %v2553_v49 }
 0xf3f   :  { %v3624_v6 = vpop.eup %3623  ;;  %3629 = vrcp.f32 %v2554_v50 }
 0xf40   :  { %v3626_v51 = vpop.eup %3625  ;;  %v2555_v54 = vadd.f32 1.0, %v3624_v6 }
 0xf41   :  { %v2556_v52 = vadd.f32 1.0, %v3626_v51 }
 0xf42   :  { %3631 = vrcp.f32 %v2555_v54 }
 0xf43   :  { %3633 = vrcp.f32 %v2556_v52 }
 0xf48   :  { %v3628_v53 = vpop.eup %3627 }
 0xf49   :  { %v3630_v62 = vpop.eup %3629  ;;  %v2565_v55 = vmul.f32 %v3628_v53, %v2453_v35 }
 0xf4a   :  { %v2566_v57 = vmul.f32 %v3630_v62, %v2455_v38 }
 0xf4b   :  { %v2569_v56 = vmul.f32 %v2565_v55, %v2530_v36 }
 0xf4c   :  { %v3632_v58 = vpop.eup %3631  ;;  %v2570_v59 = vmul.f32 %v2566_v57, %v2532_v39 }
 0xf4d   :  { %v3634_v60 = vpop.eup %3633  ;;  %v2567_v61 = vmul.f32 %v3632_v58, %v2459_v40 }
 0xf4e   :  { %v2568_v63 = vmul.f32 %v3634_v60, %v2461_v7  ;;  %2645 = vmatprep.mubr.f32.mxu1 %v2570_v59 }
 0xf4f   :  { %v2571_v0 = vmul.f32 %v2567_v61, %v2536_v41  ;;  %2646 = vmatmul.mubr.f32.vlgmr.msra.gmra.mrb[28].mxu1 %v2569_v56 }
 0xf50   :  { %v2572_v1 = vmul.f32 %v2568_v63, %v2538_v44 }
 0xf52   :  { %2650 = vmatprep.mubr.f32.mxu1 %v2572_v1 }
 0xf53   :  { %2651 = vmatmul.mubr.f32.gmra.mrb[30].mxu1 %v2571_v0 }
 0xf54   :  { %3660 = shalt.err (!%p3657_p9)
}
 0xf55   :  { %s3661_s23 = scalar_lea.hbm %s4550_s14, 256 }
 0xf56   :  { %p3662_p10 = scmp.ne.s32.totalorder %s4550_s14, %s3661_s23  ;;  %p3665_p11 = scmp.lt.u32.totalorder %s3661_s23, %s4550_s14 }
 0xf58   :  { %p3667_p12 = pnand %p3665_p11, %p3662_p10 }
 0xf5a   :  { %3670 = shalt.err (!%p3667_p12)
}
 0xf5b   :  { %s3738_s10 = smov 128   ;;  %s3739_s6 = smov [#allocation9]  }
 0xf5c   :  { %2683 = dma.vmem_to_hbm [thread:$0]  %s2678_s22, 256, %s4550_s14, [#allocation8], %s3738_s10, %s3738_s10, %s3734_s24  }
 0xf5d   :  { %s2689_s7 = sshll.u32 %s3739_s6, 4  ;;  %s2690_s7 = int_to_ptr.vmem [resolvable:$true] %s2689_s7 }
 0xf5e   :  { %s3671_s28 = scalar_lea.vmem %s2690_s7, 256  ;;  %p3676_p0 = scmp.lt.s32.totalorder %s2690_s7, %s2690_s7 }
 0xf5f   :  { %p3672_p13 = scmp.ne.s32.totalorder %s2690_s7, %s3671_s28  ;;  %p3677_p1 = scmp.lt.s32.totalorder %s3671_s28, %s3671_s28 }
 0xf61   :  { %p3678_p2 = por %p3677_p1, %p3676_p0 }
 0xf63   :  { %p3679_p3 = pnand %p3678_p2, %p3672_p13 }
 0xf65   :  { %3682 = shalt.err (!%p3679_p3)
}
 0xf66   :  { %s3683_s16 = scalar_lea.hbm %s4551_s15, 256 }
 0xf67   :  { %p3684_p4 = scmp.ne.s32.totalorder %s4551_s15, %s3683_s16  ;;  %p3687_p5 = scmp.lt.u32.totalorder %s3683_s16, %s4551_s15 }
 0xf69   :  { %p3689_p6 = pnand %p3687_p5, %p3684_p4 }
 0xf6b   :  { %3692 = shalt.err (!%p3689_p6)
}
 0xf6c   :  { %2695 = dma.vmem_to_hbm [thread:$0]  %s2690_s7, 256, %s4551_s15, [#allocation8], %s3738_s10, %s3738_s10, %s3734_s24  }
 0xf6d   :  { %s3740_s8 = smov [#allocation6]  }
 0xf6e   :  { %s2665_s20 = sshll.u32 %s3740_s8, 4  ;;  %s2666_s20 = int_to_ptr.vmem [resolvable:$true] %s2665_s20 }
 0xf6f   :  { %s3693_s21 = scalar_lea.vmem %s2666_s20, 256  ;;  %p3698_p8 = scmp.lt.s32.totalorder %s2666_s20, %s2666_s20 }
 0xf70   :  { %p3694_p7 = scmp.ne.s32.totalorder %s2666_s20, %s3693_s21  ;;  %p3699_p9 = scmp.lt.s32.totalorder %s3693_s21, %s3693_s21 }
 0xf72   :  { %p3700_p10 = por %p3699_p9, %p3698_p8 }
 0xf74   :  { %p3701_p11 = pnand %p3700_p10, %p3694_p7 }
0x1022   :  { %v2647_v2 = vpop.f32.mrb[28].mxu1 }
0x1023   :  { %v2656_v3 = vadd.f32 %v2647_v2, %v4378_v43  ;;  %v2649_v5 = vpop.f32.mrb[29].mxu1 }
0x1025   :  { %2658 = vst.msk [vmem:[#allocation6] sm:$0xff] %vm66_vm0, %v2656_v3 }
0x1026   :  { %v2652_v9 = vpop.f32.mrb[30].mxu1 }
0x1027   :  { %v2657_v10 = vadd.f32 %v2652_v9, %v4373_v22  ;;  %v2654_v11 = vpop.f32.mrb[31].mxu1 }
0x1029   :  { %2659 = vst.msk [vmem:[#allocation6 + $0x8] sm:$0xff] %vm66_vm0, %v2657_v10 }
0x102a   :  { %3704 = shalt.err (!%p3701_p11)
}
0x102b   :  { %s3705_s22 = scalar_lea.hbm %s4549_s13, 256 }
0x102c   :  { %p3706_p12 = scmp.ne.s32.totalorder %s4549_s13, %s3705_s22  ;;  %p3709_p13 = scmp.lt.u32.totalorder %s3705_s22, %s4549_s13 }
0x102e   :  { %p3711_p0 = pnand %p3709_p13, %p3706_p12 }
0x1030   :  { %3714 = shalt.err (!%p3711_p0)
}
0x1031   :  { %2671 = dma.vmem_to_hbm [thread:$0]  %s2666_s20, 256, %s4549_s13, [#allocation4], %s3738_s10, %s3738_s10, %s3734_s24  }
0x1032   :  { %3717 = dma.done.wait [#allocation4], 256  }
0x1033   :  { %3718 = vsyncadd [#allocation4], 4294967040 }
0x1034   :  { %3719 = dma.done.wait [#allocation8], 512  }
0x1035   :  { %3720 = vsyncadd [#allocation8], 4294966784 }
0x1036   :  { %2705 = vsyncpa [#allocation4], 1 }
0x1037   :  { %2706 = vsyncpa [#allocation8], 1 }
0x1038   :  { %2707 = vsyncpa [#allocation5], 1 }

</bundles_post_ra>
